<compile_context>
chip_gen: v6e
topology: v6e:2x2x1
jax: 0.10.0
libtpu: 0.0.40
codegen_flags: <defaults>
</compile_context>

<pallas_src>
import functools

import jax
import jax.numpy as jnp
from jax import lax
from jax.experimental import pallas as pl
from jax.experimental.pallas import tpu as pltpu


# ----- HP choices (the module's hyper-params), fixed deterministically -------
class HP:
    DROPOUT = 0.0                    # -> prolog is Identity
    NONLIN_IS_TANH = True            # HP.NONLIN == HP.NonLinKind_TANH
    BOTTLENECK_EXPANSION_RATIO = 2
    LAYER_NORM = True
    LN_EPS = 1e-5


# ------------------------------- Pallas kernel -------------------------------
def _cat_nonlin_kernel(x_ref, w1_ref, b1_ref, w2_ref, b2_ref, g_ref, beta_ref,
                       o_ref):
    # x_ref : (tile_b, arit*dim) pre-concatenated  OR  (arit, tile_b, dim) stacked.
    # w1_ref/w2_ref arrive already cast (wrapper-side) to the MXU dtype;
    # biases / LayerNorm params stay f32 (v5e VPU/EUP have no bf16).
    mxu_dtype = w1_ref.dtype

    if x_ref.ndim == 2:
        # Single K=arit*dim matmul: fills the systolic depth better, one MXU
        # push / pop instead of `arit` of them.
        acc = jnp.dot(x_ref[...].astype(mxu_dtype), w1_ref[...],
                      preferred_element_type=jnp.float32)
    else:
        # cat(args) @ W1 == sum_k args_k @ W1_k -> the concat never materializes.
        arit = x_ref.shape[0]
        acc = None
        for k in range(arit):                                  # static, unrolled
            p = jnp.dot(x_ref[k].astype(mxu_dtype), w1_ref[k],
                        preferred_element_type=jnp.float32)
            acc = p if acc is None else acc + p

    # Bias / nonlin / LayerNorm all stay f32.
    h = acc + b1_ref[...].astype(jnp.float32)                  # (tile_b, hid)
    if HP.NONLIN_IS_TANH:
        h = jnp.tanh(h)        # EUP slot; free filler in this HBM-bound kernel
    else:
        h = jnp.maximum(h, 0.0)

    y = jnp.dot(h.astype(w2_ref.dtype), w2_ref[...],
                preferred_element_type=jnp.float32)
    y = y + b2_ref[...].astype(jnp.float32)                    # (tile_b, dim)

    if HP.LAYER_NORM:
        # Fused one-pass statistics: var = E[y^2] - mean^2
        # (no separate centered pass over y before the second reduce).
        inv_d = 1.0 / y.shape[-1]
        s1 = jnp.sum(y, axis=-1, keepdims=True)
        s2 = jnp.sum(y * y, axis=-1, keepdims=True)
        mean = s1 * inv_d
        var = s2 * inv_d - mean * mean
        y = (y - mean) * lax.rsqrt(var + HP.LN_EPS)
        y = y * g_ref[...].astype(jnp.float32) + beta_ref[...].astype(jnp.float32)

    o_ref[...] = y.astype(o_ref.dtype)


def _pick_tile_b(B, *, min_steps=2, max_rows=1024):
    """Largest multiple-of-8 row tile dividing B with >= min_steps grid steps."""
    assert B % 8 == 0, "pad the batch to a multiple of 8 (f32 sublane packing)"
    tile = min(max_rows, max(8, B // max(min_steps, 1)))
    tile -= tile % 8
    tile = max(tile, 8)
    while B % tile != 0:
        tile -= 8
    return tile


def cat_and_nonlinear_batched(params, x, *, tile_b=None, min_steps=2,
                              mxu_dtype=jnp.bfloat16):
    """Batched forward_impl.

    x: (arit, B, dim) stacked (x[k, b] = k-th argument vector of call b), or
       (B, arit*dim) if the producer already emits concatenated rows.
    Returns (B, dim).

    min_steps: lower bound on grid steps.  Default 2 keeps DMA/compute
      pipelining on single-TC chips (v5e / v6e, where extra steps are pure
      ~600-cycle overhead); use 4 on v7x so the "parallel" grid axis gives
      both TensorCores >= 2 steps each.
    mxu_dtype: matmul-input dtype.  Weights are pre-cast once wrapper-side.
      Use None for full-f32 matmuls (exact torch parity; MXU cost negligible).
    """
    arit, dim, hid = params["w1"].shape
    precat = (x.ndim == 2)
    if precat:
        B, in1 = x.shape
        assert in1 == arit * dim
        w1 = params["w1"].reshape(arit * dim, hid)   # free contiguous reshape
    else:
        assert x.shape[0] == arit and x.shape[2] == dim
        B = x.shape[1]
        w1 = params["w1"]
    w2 = params["w2"]
    if mxu_dtype is not None:
        # Pre-cast ONCE in the wrapper: no per-step VPU cast of the resident
        # weights inside the kernel, and half the weight DMA.
        w1 = w1.astype(mxu_dtype)
        w2 = w2.astype(mxu_dtype)

    if tile_b is None:
        tile_b = _pick_tile_b(B, min_steps=min_steps)
    assert tile_b % 8 == 0 and B % tile_b == 0

    if precat:
        x_spec = pl.BlockSpec((tile_b, arit * dim), lambda i: (i, 0))
        w1_spec = pl.BlockSpec((arit * dim, hid), lambda i: (0, 0))
    else:
        x_spec = pl.BlockSpec((arit, tile_b, dim), lambda i: (0, i, 0))
        w1_spec = pl.BlockSpec((arit, dim, hid), lambda i: (0, 0, 0))

    return pl.pallas_call(
        _cat_nonlin_kernel,
        out_shape=jax.ShapeDtypeStruct((B, dim), x.dtype),
        grid=(B // tile_b,),
        in_specs=[
            # Only x is tiled over the grid axis.
            x_spec,
            # Everything below: full-array block + constant index_map
            # -> DMA'd to VMEM once, resident across all row tiles.
            w1_spec,
            pl.BlockSpec((1, hid), lambda i: (0, 0)),    # b1   (f32)
            pl.BlockSpec((hid, dim), lambda i: (0, 0)),  # w2
            pl.BlockSpec((1, dim), lambda i: (0, 0)),    # b2   (f32)
            pl.BlockSpec((1, dim), lambda i: (0, 0)),    # gamma(f32)
            pl.BlockSpec((1, dim), lambda i: (0, 0)),    # beta (f32)
        ],
        out_specs=pl.BlockSpec((tile_b, dim), lambda i: (i, 0)),
        compiler_params=pltpu.CompilerParams(
            dimension_semantics=("parallel",),   # v7x: shard row tiles over 2 TCs
        ),
    )(x, w1, params["b1"], w2, params["b2"], params["gamma"], params["beta"])


# ------------------------------ Module wrapper --------------------------------
def init_params(key, dim, arit, dtype=jnp.float32):
    """Deterministic init mimicking torch.nn.Linear (U(-1/sqrt(fan_in), ...)).

    W1 is stored *split* as (arit, dim, hid) (== the PyTorch (hid, arit*dim)
    weight, transposed and sliced per concatenated argument); W2 as (hid, dim).
    """
    in1 = arit * dim
    hid = dim * HP.BOTTLENECK_EXPANSION_RATIO
    k1, k2, k3, k4 = jax.random.split(key, 4)
    lim1 = 1.0 / jnp.sqrt(in1)
    lim2 = 1.0 / jnp.sqrt(hid)
    return dict(
        w1=jax.random.uniform(k1, (arit, dim, hid), dtype, -lim1, lim1),
        b1=jax.random.uniform(k2, (1, hid), dtype, -lim1, lim1),
        w2=jax.random.uniform(k3, (hid, dim), dtype, -lim2, lim2),
        b2=jax.random.uniform(k4, (1, dim), dtype, -lim2, lim2),
        gamma=jnp.ones((1, dim), dtype),   # LayerNorm weight
        beta=jnp.zeros((1, dim), dtype),   # LayerNorm bias
    )


def forward_impl(args, params):
    """Module forward_impl for ONE call (list of (dim,) vectors).

    At B=1 the pallas custom-call boundary dominates ~16 KFLOP of work, so
    this path stays a plain fused XLA expression; the Pallas kernel
    (cat_and_nonlinear_batched) serves the batched variant.
    """
    arit = len(args)
    dim = args[0].shape[0]
    x = jnp.concatenate(args, axis=0)[None, :].astype(jnp.float32)
    w1 = params["w1"].reshape(arit * dim, -1)
    h = jnp.dot(x, w1, preferred_element_type=jnp.float32,
                precision=lax.Precision.HIGHEST) + params["b1"]
    h = jnp.tanh(h) if HP.NONLIN_IS_TANH else jnp.maximum(h, 0.0)
    y = jnp.dot(h, params["w2"], preferred_element_type=jnp.float32,
                precision=lax.Precision.HIGHEST) + params["b2"]
    if HP.LAYER_NORM:
        mean = jnp.mean(y, axis=-1, keepdims=True)
        var = jnp.mean((y - mean) ** 2, axis=-1, keepdims=True)
        y = (y - mean) * lax.rsqrt(var + HP.LN_EPS)
        y = y * params["gamma"] + params["beta"]
    return y[0]


def forward(args, params):
    # The PyTorch module's forward() literally returns args[0].
    del params
    return args[0]


# ------------------------------ Reference (JAX) --------------------------------
def ref_batched(params, x_stacked, mxu_dtype=None):
    """Pure-jnp batched reference.  mxu_dtype mirrors the kernel's matmul cast."""
    arit, B, dim = x_stacked.shape
    hid = params["w1"].shape[-1]
    # Per-row torch.cat(args): (arit, B, dim) -> (B, arit*dim)
    x = jnp.transpose(x_stacked, (1, 0, 2)).reshape(B, arit * dim)
    w1 = params["w1"].reshape(arit * dim, hid)

    def mm(a, b):
        if mxu_dtype is None:
            return jnp.dot(a, b, preferred_element_type=jnp.float32,
                           precision=lax.Precision.HIGHEST)
        return jnp.dot(a.astype(mxu_dtype), b.astype(mxu_dtype),
                       preferred_element_type=jnp.float32)

    h = mm(x.astype(jnp.float32), w1) + params["b1"]
    h = jnp.tanh(h) if HP.NONLIN_IS_TANH else jnp.maximum(h, 0.0)
    y = mm(h, params["w2"]) + params["b2"]
    if HP.LAYER_NORM:
        mean = jnp.mean(y, axis=-1, keepdims=True)
        var = jnp.mean((y - mean) ** 2, axis=-1, keepdims=True)
        y = (y - mean) / jnp.sqrt(var + HP.LN_EPS)
        y = y * params["gamma"] + params["beta"]
    return y


# ------------------------------------ main -------------------------------------
if __name__ == "__main__":
    dim, arit = 32, 3
    B = 512

    key = jax.random.PRNGKey(0)
    kp, kx = jax.random.split(key)
    params = init_params(kp, dim, arit)
    # x_stacked[k, b] = k-th argument vector of call b
    x_stacked = jax.random.normal(kx, (arit, B, dim), jnp.float32)

    # --- stacked-args path: auto tile -> 2 grid steps (256 rows/step here). ---
    # (On v7x pass min_steps=4 so both TensorCores get >=2 steps each.)
    run = jax.jit(functools.partial(cat_and_nonlinear_batched,
                                    min_steps=2, mxu_dtype=jnp.bfloat16))
    out = jax.block_until_ready(run(params, x_stacked))
    assert out.shape == (B, dim)

    # --- pre-concatenated producer layout: single K=arit*dim matmul in-kernel ---
    x_cat = jnp.transpose(x_stacked, (1, 0, 2)).reshape(B, arit * dim)
    run_cat = jax.jit(functools.partial(cat_and_nonlinear_batched,
                                        min_steps=2, mxu_dtype=jnp.bfloat16))
    out_cat = jax.block_until_ready(run_cat(params, x_cat))
    assert out_cat.shape == (B, dim)

    # Check both kernel paths vs a reference mirroring the bf16 matmul-input cast.
    ref_b = ref_batched(params, x_stacked, mxu_dtype=jnp.bfloat16)
    err_b = jnp.max(jnp.abs(out - ref_b))
    assert jnp.allclose(out, ref_b, atol=2e-3, rtol=2e-3), (
        f"stacked path: bf16-mirrored mismatch: max abs err {err_b}")
    err_c = jnp.max(jnp.abs(out_cat - ref_b))
    assert jnp.allclose(out_cat, ref_b, atol=2e-3, rtol=2e-3), (
        f"pre-concat path: bf16-mirrored mismatch: max abs err {err_c}")

    # Sanity vs the full-f32 reference (bf16 matmul rounding only).
    ref_f = ref_batched(params, x_stacked, mxu_dtype=None)
    err_f = jnp.max(jnp.abs(out - ref_f))
    assert jnp.allclose(out, ref_f, atol=3e-2, rtol=0), (
        f"f32-reference mismatch: max abs err {err_f}")

    # Full-f32 kernel variant (exact torch-parity matmuls), tighter tolerance.
    run_f32 = jax.jit(functools.partial(cat_and_nonlinear_batched,
                                        min_steps=2, mxu_dtype=None))
    out_f32 = jax.block_until_ready(run_f32(params, x_stacked))
    err_x = jnp.max(jnp.abs(out_f32 - ref_f))
    assert jnp.allclose(out_f32, ref_f, atol=1e-4, rtol=1e-4), (
        f"f32-kernel mismatch: max abs err {err_x}")

    # --- single-call module semantics (plain fused XLA path, per review) ---
    args0 = [x_stacked[k, 0] for k in range(arit)]
    single = jax.block_until_ready(jax.jit(forward_impl)(args0, params))
    assert single.shape == (dim,)
    assert jnp.allclose(single, ref_f[0], atol=1e-4, rtol=1e-4), (
        "single-call forward_impl mismatch")

    # module's literal forward(): returns args[0]
    _ = jax.block_until_ready(forward(args0, params))

    print("KERNEL_OK")
</pallas_src>

<mosaic_0001>
module attributes {stable_mosaic.version = 11 : i64} {
  func.func @_cat_nonlin_kernel(%arg0: i32, %arg1: memref<3x256x32xf32, #tpu.memory_space<vmem>>, %arg2: memref<3x32x64xbf16, #tpu.memory_space<vmem>>, %arg3: memref<1x64xf32, #tpu.memory_space<vmem>>, %arg4: memref<64x32xbf16, #tpu.memory_space<vmem>>, %arg5: memref<1x32xf32, #tpu.memory_space<vmem>>, %arg6: memref<1x32xf32, #tpu.memory_space<vmem>>, %arg7: memref<1x32xf32, #tpu.memory_space<vmem>>, %arg8: memref<256x32xf32, #tpu.memory_space<vmem>>) attributes {dimension_semantics = [#tpu.dimension_semantics<parallel>], iteration_bounds = array<i64: 2>, scalar_prefetch = 0 : i64, scratch_operands = 0 : i64, tpu.core_type = #tpu.core_type<tc>, window_params = [{transform_indices = @transform_0, window_bounds = array<i64: 3, 256, 32>}, {pipeline_mode = #tpu.pipeline_mode<synchronous>, transform_indices = @transform_1, window_bounds = array<i64: 3, 32, 64>}, {pipeline_mode = #tpu.pipeline_mode<synchronous>, transform_indices = @transform_2, window_bounds = array<i64: 1, 64>}, {pipeline_mode = #tpu.pipeline_mode<synchronous>, transform_indices = @transform_3, window_bounds = array<i64: 64, 32>}, {pipeline_mode = #tpu.pipeline_mode<synchronous>, transform_indices = @transform_4, window_bounds = array<i64: 1, 32>}, {pipeline_mode = #tpu.pipeline_mode<synchronous>, transform_indices = @transform_5, window_bounds = array<i64: 1, 32>}, {pipeline_mode = #tpu.pipeline_mode<synchronous>, transform_indices = @transform_6, window_bounds = array<i64: 1, 32>}, {transform_indices = @transform_7, window_bounds = array<i64: 256, 32>}]} {
    %c0 = arith.constant 0 : index
    %c0_0 = arith.constant 0 : index
    %c0_1 = arith.constant 0 : index
    %0 = vector.load %arg1[%c0, %c0_0, %c0_1] : memref<3x256x32xf32, #tpu.memory_space<vmem>>, vector<1x256x32xf32>
    %1 = vector.shape_cast %0 : vector<1x256x32xf32> to vector<256x32xf32>
    %2 = arith.truncf %1 : vector<256x32xf32> to vector<256x32xbf16>
    %c0_2 = arith.constant 0 : index
    %c0_3 = arith.constant 0 : index
    %c0_4 = arith.constant 0 : index
    %3 = vector.load %arg2[%c0_2, %c0_3, %c0_4] : memref<3x32x64xbf16, #tpu.memory_space<vmem>>, vector<1x32x64xbf16>
    %4 = vector.shape_cast %3 : vector<1x32x64xbf16> to vector<32x64xbf16>
    %cst = arith.constant dense<0.000000e+00> : vector<256x64xf32>
    %5 = tpu.matmul %2, %4, %cst {dimension_numbers = #tpu.dot_dimension_numbers<[1], [0], [0], [1], [0, 0, 1, 1], [], []>} : vector<256x32xbf16>, vector<32x64xbf16>, vector<256x64xf32> -> vector<256x64xf32>
    %c1 = arith.constant 1 : index
    %c0_5 = arith.constant 0 : index
    %c0_6 = arith.constant 0 : index
    %6 = vector.load %arg1[%c1, %c0_5, %c0_6] : memref<3x256x32xf32, #tpu.memory_space<vmem>>, vector<1x256x32xf32>
    %7 = vector.shape_cast %6 : vector<1x256x32xf32> to vector<256x32xf32>
    %8 = arith.truncf %7 : vector<256x32xf32> to vector<256x32xbf16>
    %c1_7 = arith.constant 1 : index
    %c0_8 = arith.constant 0 : index
    %c0_9 = arith.constant 0 : index
    %9 = vector.load %arg2[%c1_7, %c0_8, %c0_9] : memref<3x32x64xbf16, #tpu.memory_space<vmem>>, vector<1x32x64xbf16>
    %10 = vector.shape_cast %9 : vector<1x32x64xbf16> to vector<32x64xbf16>
    %cst_10 = arith.constant dense<0.000000e+00> : vector<256x64xf32>
    %11 = tpu.matmul %8, %10, %cst_10 {dimension_numbers = #tpu.dot_dimension_numbers<[1], [0], [0], [1], [0, 0, 1, 1], [], []>} : vector<256x32xbf16>, vector<32x64xbf16>, vector<256x64xf32> -> vector<256x64xf32>
    %12 = arith.addf %5, %11 : vector<256x64xf32>
    %c2 = arith.constant 2 : index
    %c0_11 = arith.constant 0 : index
    %c0_12 = arith.constant 0 : index
    %13 = vector.load %arg1[%c2, %c0_11, %c0_12] : memref<3x256x32xf32, #tpu.memory_space<vmem>>, vector<1x256x32xf32>
    %14 = vector.shape_cast %13 : vector<1x256x32xf32> to vector<256x32xf32>
    %15 = arith.truncf %14 : vector<256x32xf32> to vector<256x32xbf16>
    %c2_13 = arith.constant 2 : index
    %c0_14 = arith.constant 0 : index
    %c0_15 = arith.constant 0 : index
    %16 = vector.load %arg2[%c2_13, %c0_14, %c0_15] : memref<3x32x64xbf16, #tpu.memory_space<vmem>>, vector<1x32x64xbf16>
    %17 = vector.shape_cast %16 : vector<1x32x64xbf16> to vector<32x64xbf16>
    %cst_16 = arith.constant dense<0.000000e+00> : vector<256x64xf32>
    %18 = tpu.matmul %15, %17, %cst_16 {dimension_numbers = #tpu.dot_dimension_numbers<[1], [0], [0], [1], [0, 0, 1, 1], [], []>} : vector<256x32xbf16>, vector<32x64xbf16>, vector<256x64xf32> -> vector<256x64xf32>
    %19 = arith.addf %12, %18 : vector<256x64xf32>
    %c0_17 = arith.constant 0 : index
    %c0_18 = arith.constant 0 : index
    %20 = vector.load %arg3[%c0_17, %c0_18] : memref<1x64xf32, #tpu.memory_space<vmem>>, vector<1x64xf32>
    %21 = vector.broadcast %20 : vector<1x64xf32> to vector<256x64xf32>
    %22 = arith.addf %19, %21 : vector<256x64xf32>
    %23 = math.tanh %22 : vector<256x64xf32>
    %24 = arith.truncf %23 : vector<256x64xf32> to vector<256x64xbf16>
    %c0_19 = arith.constant 0 : index
    %c0_20 = arith.constant 0 : index
    %25 = vector.load %arg4[%c0_19, %c0_20] : memref<64x32xbf16, #tpu.memory_space<vmem>>, vector<64x32xbf16>
    %cst_21 = arith.constant dense<0.000000e+00> : vector<256x32xf32>
    %26 = tpu.matmul %24, %25, %cst_21 {dimension_numbers = #tpu.dot_dimension_numbers<[1], [0], [0], [1], [0, 0, 1, 1], [], []>} : vector<256x64xbf16>, vector<64x32xbf16>, vector<256x32xf32> -> vector<256x32xf32>
    %c0_22 = arith.constant 0 : index
    %c0_23 = arith.constant 0 : index
    %27 = vector.load %arg5[%c0_22, %c0_23] : memref<1x32xf32, #tpu.memory_space<vmem>>, vector<1x32xf32>
    %28 = vector.broadcast %27 : vector<1x32xf32> to vector<256x32xf32>
    %29 = arith.addf %26, %28 : vector<256x32xf32>
    %cst_24 = arith.constant dense<0.000000e+00> : vector<256xf32>
    %30 = vector.multi_reduction <add>, %29, %cst_24 [1] : vector<256x32xf32> to vector<256xf32>
    %31 = vector.shape_cast %30 : vector<256xf32> to vector<256x1xf32>
    %32 = arith.mulf %29, %29 : vector<256x32xf32>
    %cst_25 = arith.constant dense<0.000000e+00> : vector<256xf32>
    %33 = vector.multi_reduction <add>, %32, %cst_25 [1] : vector<256x32xf32> to vector<256xf32>
    %34 = vector.shape_cast %33 : vector<256xf32> to vector<256x1xf32>
    %cst_26 = arith.constant 3.125000e-02 : f32
    %35 = vector.broadcast %cst_26 : f32 to vector<256x1xf32>
    %36 = arith.mulf %31, %35 : vector<256x1xf32>
    %cst_27 = arith.constant 3.125000e-02 : f32
    %37 = vector.broadcast %cst_27 : f32 to vector<256x1xf32>
    %38 = arith.mulf %34, %37 : vector<256x1xf32>
    %39 = arith.mulf %36, %36 : vector<256x1xf32>
    %40 = arith.subf %38, %39 : vector<256x1xf32>
    %41 = vector.broadcast %36 : vector<256x1xf32> to vector<256x32xf32>
    %42 = arith.subf %29, %41 : vector<256x32xf32>
    %cst_28 = arith.constant 9.99999974E-6 : f32
    %43 = vector.broadcast %cst_28 : f32 to vector<256x1xf32>
    %44 = arith.addf %40, %43 : vector<256x1xf32>
    %45 = math.rsqrt %44 : vector<256x1xf32>
    %46 = vector.broadcast %45 : vector<256x1xf32> to vector<256x32xf32>
    %47 = arith.mulf %42, %46 : vector<256x32xf32>
    %c0_29 = arith.constant 0 : index
    %c0_30 = arith.constant 0 : index
    %48 = vector.load %arg6[%c0_29, %c0_30] : memref<1x32xf32, #tpu.memory_space<vmem>>, vector<1x32xf32>
    %49 = vector.broadcast %48 : vector<1x32xf32> to vector<256x32xf32>
    %50 = arith.mulf %47, %49 : vector<256x32xf32>
    %c0_31 = arith.constant 0 : index
    %c0_32 = arith.constant 0 : index
    %51 = vector.load %arg7[%c0_31, %c0_32] : memref<1x32xf32, #tpu.memory_space<vmem>>, vector<1x32xf32>
    %52 = vector.broadcast %51 : vector<1x32xf32> to vector<256x32xf32>
    %53 = arith.addf %50, %52 : vector<256x32xf32>
    %c0_33 = arith.constant 0 : index
    %c0_34 = arith.constant 0 : index
    %54 = vector.load %arg8[%c0_33, %c0_34] : memref<256x32xf32, #tpu.memory_space<vmem>>, vector<256x32xf32>
    tpu.vector_store %arg8[%c0_33, %c0_34], %53 {strides = array<i32>} : memref<256x32xf32, #tpu.memory_space<vmem>>, vector<256x32xf32>,
    return
  }
  func.func @transform_0(%arg0: i32) -> (i32, i32, i32) {
    %c0_i32 = arith.constant 0 : i32
    %c0_i32_0 = arith.constant 0 : i32
    %c0_i32_1 = arith.constant 0 : i32
    return %c0_i32, %arg0, %c0_i32_0 : i32, i32, i32
  }
  func.func @transform_1(%arg0: i32) -> (i32, i32, i32) {
    %c0_i32 = arith.constant 0 : i32
    %c0_i32_0 = arith.constant 0 : i32
    %c0_i32_1 = arith.constant 0 : i32
    %c0_i32_2 = arith.constant 0 : i32
    return %c0_i32, %c0_i32_0, %c0_i32_1 : i32, i32, i32
  }
  func.func @transform_2(%arg0: i32) -> (i32, i32) {
    %c0_i32 = arith.constant 0 : i32
    %c0_i32_0 = arith.constant 0 : i32
    %c0_i32_1 = arith.constant 0 : i32
    return %c0_i32, %c0_i32_0 : i32, i32
  }
  func.func @transform_3(%arg0: i32) -> (i32, i32) {
    %c0_i32 = arith.constant 0 : i32
    %c0_i32_0 = arith.constant 0 : i32
    %c0_i32_1 = arith.constant 0 : i32
    return %c0_i32, %c0_i32_0 : i32, i32
  }
  func.func @transform_4(%arg0: i32) -> (i32, i32) {
    %c0_i32 = arith.constant 0 : i32
    %c0_i32_0 = arith.constant 0 : i32
    %c0_i32_1 = arith.constant 0 : i32
    return %c0_i32, %c0_i32_0 : i32, i32
  }
  func.func @transform_5(%arg0: i32) -> (i32, i32) {
    %c0_i32 = arith.constant 0 : i32
    %c0_i32_0 = arith.constant 0 : i32
    %c0_i32_1 = arith.constant 0 : i32
    return %c0_i32, %c0_i32_0 : i32, i32
  }
  func.func @transform_6(%arg0: i32) -> (i32, i32) {
    %c0_i32 = arith.constant 0 : i32
    %c0_i32_0 = arith.constant 0 : i32
    %c0_i32_1 = arith.constant 0 : i32
    return %c0_i32, %c0_i32_0 : i32, i32
  }
  func.func @transform_7(%arg0: i32) -> (i32, i32) {
    %c0_i32 = arith.constant 0 : i32
    %c0_i32_0 = arith.constant 0 : i32
    return %arg0, %c0_i32 : i32, i32
  }
}

</mosaic_0001>

<bundles_post_ra>
// kernel: cat_and_nonlinear_batched.1
= control target key start
LH: loop header
LB: loop body
LE: loop exit
PB: predicated region body
PF: predicated region fallthrough
CT: control target
= control target key end

     0   :  { %s3154_s24 = smov 0   ;;  %s3156_s25 = smov 0   ;;  %s4328_s0 = inlined_call_operand.vmem [shape: f32[3,512,32], index: 0, kind: input, shape index: {}]   ;;  %s4329_s1 = inlined_call_operand.vmem [shape: bf16[3,32,64], index: 1, kind: input, shape index: {}]   ;;  %s4330_s2 = inlined_call_operand.vmem [shape: f32[1,64], index: 2, kind: input, shape index: {}]   ;;  %s4331_s3 = inlined_call_operand.vmem [shape: bf16[64,32], index: 3, kind: input, shape index: {}]   ;;  %s4332_s4 = inlined_call_operand.vmem [shape: f32[1,32], index: 4, kind: input, shape index: {}]   ;;  %s4333_s5 = inlined_call_operand.vmem [shape: f32[1,32], index: 5, kind: input, shape index: {}]   ;;  %s4334_s6 = inlined_call_operand.vmem [shape: f32[1,32], index: 6, kind: input, shape index: {}]   ;;  %s4335_s7 = inlined_call_operand.vmem [shape: f32[512,32], index: 7, kind: output, shape index: {}]  }
   0x1   :  { %s3158_s26 = smov 0  }
   0x2 LB: > { %s2542_s27 = sadd.s32 4294967295, %s3112_s26   ;;  %s3171_s28 = sadd.s32 1, %s3112_s26   ;;  %s3112_s26 = sphi %s3158_s26, %s4338_s26   ;;  %s3108_s25 = sphi %s3156_s25, %s4337_s25   ;;  %s3104_s24 = sphi %s3154_s24, %s4336_s24  }
   0x3   : > { %s21_s29 = ssub.s32 %s3112_s26, %s3171_s28  ;;  %s24_s30 = sadd.s32 1, %s3108_s25 }
   0x4   : > { %p22_p0 = scmp.eq.s32.totalorder %s21_s29, 0  ;;  %p31_p1 = scmp.ne.s32.totalorder %s3108_s25, %s3104_s24 }
   0x5   : > { %p32_p2 = scmp.eq.s32.totalorder %s3112_s26, 0  ;;  %p2545_p4 = scmp.ge.s32.totalorder %s3112_s26, 2 }
   0x6   : > { %s3180_s8 = scalar_select %p22_p0, %s3108_s25, %s24_s30  }
   0x7   : > { %p33_p3 = por %p32_p2, %p31_p1  ;;  %227 = sbr.rel (%p2545_p4) target bundleno = 65 (0x41), region = 40 }
   0xc   : > { %230 = sbr.rel (!%p33_p3) target bundleno = 65 (0x41), region = 44  ;;  %s232_s9 = sand.u32 (%p33_p3), 1, %s3108_s25  }
   0xd   : > { %s2703_s10 = sshll.u32 (%p33_p3), %s3112_s26, 8  ;;  %s2926_s11 = smul.u32 (%p33_p3), 768, %s232_s9 }
   0xe   : > { %s3188_s14 = scalar_lea.vmem (%p33_p3), %s4328_s0, %s2703_s10 }
   0xf   : > { %v456_v0 = vld [vmem:[%s3188_s14] sm:$0xff] (%p33_p3)  ;;  %v458_v1 = vld [vmem:[%s3188_s14 + $0x8] sm:$0xff] (%p33_p3)  ;;  %v460_v2 = vld [vmem:[%s3188_s14 + $0x10] sm:$0xff] (%p33_p3)  ;;  %s3196_s15 = scalar_lea.vmem (%p33_p3), [#allocation2], %s2926_s11 }
  0x10   : > { %v462_v3 = vld [vmem:[%s3188_s14 + $0x18] sm:$0xff] (%p33_p3)  ;;  %v464_v4 = vld [vmem:[%s3188_s14 + $0x20] sm:$0xff] (%p33_p3)  ;;  %v466_v5 = vld [vmem:[%s3188_s14 + $0x28] sm:$0xff] (%p33_p3)  ;;  %457 = vst [vmem:[%s3196_s15] sm:$0xff] (%p33_p3), %v456_v0 }
  0x11   : > { %459 = vst [vmem:[%s3196_s15 + $0x8] sm:$0xff] %v458_v1  ;;  %461 = vst [vmem:[%s3196_s15 + $0x10] sm:$0xff] %v460_v2  ;;  %v468_v6 = vld [vmem:[%s3188_s14 + $0x30] sm:$0xff]  ;;  %v470_v7 = vld [vmem:[%s3188_s14 + $0x38] sm:$0xff] }
  0x12   : > { %463 = vst [vmem:[%s3196_s15 + $0x18] sm:$0xff] %v462_v3  ;;  %465 = vst [vmem:[%s3196_s15 + $0x20] sm:$0xff] %v464_v4  ;;  %v472_v8 = vld [vmem:[%s3188_s14 + $0x40] sm:$0xff]  ;;  %v474_v9 = vld [vmem:[%s3188_s14 + $0x48] sm:$0xff] }
  0x13   : > { %467 = vst [vmem:[%s3196_s15 + $0x28] sm:$0xff] %v466_v5  ;;  %469 = vst [vmem:[%s3196_s15 + $0x30] sm:$0xff] %v468_v6  ;;  %v476_v10 = vld [vmem:[%s3188_s14 + $0x50] sm:$0xff]  ;;  %v478_v11 = vld [vmem:[%s3188_s14 + $0x58] sm:$0xff] }
  0x14   : > { %471 = vst [vmem:[%s3196_s15 + $0x38] sm:$0xff] %v470_v7  ;;  %473 = vst [vmem:[%s3196_s15 + $0x40] sm:$0xff] %v472_v8  ;;  %v480_v12 = vld [vmem:[%s3188_s14 + $0x60] sm:$0xff]  ;;  %v482_v13 = vld [vmem:[%s3188_s14 + $0x68] sm:$0xff] }
  0x15   : > { %475 = vst [vmem:[%s3196_s15 + $0x48] sm:$0xff] %v474_v9  ;;  %477 = vst [vmem:[%s3196_s15 + $0x50] sm:$0xff] %v476_v10  ;;  %v484_v14 = vld [vmem:[%s3188_s14 + $0x70] sm:$0xff]  ;;  %v486_v15 = vld [vmem:[%s3188_s14 + $0x78] sm:$0xff] }
  0x16   : > { %479 = vst [vmem:[%s3196_s15 + $0x58] sm:$0xff] %v478_v11  ;;  %481 = vst [vmem:[%s3196_s15 + $0x60] sm:$0xff] %v480_v12  ;;  %v488_v16 = vld [vmem:[%s3188_s14 + $0x80] sm:$0xff]  ;;  %v490_v17 = vld [vmem:[%s3188_s14 + $0x88] sm:$0xff] }
  0x17   : > { %483 = vst [vmem:[%s3196_s15 + $0x68] sm:$0xff] %v482_v13  ;;  %485 = vst [vmem:[%s3196_s15 + $0x70] sm:$0xff] %v484_v14  ;;  %v492_v18 = vld [vmem:[%s3188_s14 + $0x90] sm:$0xff]  ;;  %v494_v19 = vld [vmem:[%s3188_s14 + $0x98] sm:$0xff] }
  0x18   : > { %487 = vst [vmem:[%s3196_s15 + $0x78] sm:$0xff] %v486_v15  ;;  %489 = vst [vmem:[%s3196_s15 + $0x80] sm:$0xff] %v488_v16  ;;  %v496_v20 = vld [vmem:[%s3188_s14 + $0xa0] sm:$0xff]  ;;  %v498_v21 = vld [vmem:[%s3188_s14 + $0xa8] sm:$0xff] }
  0x19   : > { %491 = vst [vmem:[%s3196_s15 + $0x88] sm:$0xff] %v490_v17  ;;  %493 = vst [vmem:[%s3196_s15 + $0x90] sm:$0xff] %v492_v18  ;;  %v500_v22 = vld [vmem:[%s3188_s14 + $0xb0] sm:$0xff]  ;;  %v502_v23 = vld [vmem:[%s3188_s14 + $0xb8] sm:$0xff] }
  0x1a   : > { %495 = vst [vmem:[%s3196_s15 + $0x98] sm:$0xff] %v494_v19  ;;  %497 = vst [vmem:[%s3196_s15 + $0xa0] sm:$0xff] %v496_v20  ;;  %v504_v24 = vld [vmem:[%s3188_s14 + $0xc0] sm:$0xff]  ;;  %v506_v25 = vld [vmem:[%s3188_s14 + $0xc8] sm:$0xff] }
  0x1b   : > { %499 = vst [vmem:[%s3196_s15 + $0xa8] sm:$0xff] %v498_v21  ;;  %501 = vst [vmem:[%s3196_s15 + $0xb0] sm:$0xff] %v500_v22  ;;  %v508_v26 = vld [vmem:[%s3188_s14 + $0xd0] sm:$0xff]  ;;  %v510_v27 = vld [vmem:[%s3188_s14 + $0xd8] sm:$0xff] }
  0x1c   : > { %503 = vst [vmem:[%s3196_s15 + $0xb8] sm:$0xff] %v502_v23  ;;  %505 = vst [vmem:[%s3196_s15 + $0xc0] sm:$0xff] %v504_v24  ;;  %v512_v28 = vld [vmem:[%s3188_s14 + $0xe0] sm:$0xff]  ;;  %v514_v29 = vld [vmem:[%s3188_s14 + $0xe8] sm:$0xff] }
  0x1d   : > { %507 = vst [vmem:[%s3196_s15 + $0xc8] sm:$0xff] %v506_v25  ;;  %509 = vst [vmem:[%s3196_s15 + $0xd0] sm:$0xff] %v508_v26  ;;  %v516_v30 = vld [vmem:[%s3188_s14 + $0xf0] sm:$0xff]  ;;  %v518_v31 = vld [vmem:[%s3188_s14 + $0xf8] sm:$0xff] }
  0x1e   : > { %511 = vst [vmem:[%s3196_s15 + $0xd8] sm:$0xff] %v510_v27  ;;  %513 = vst [vmem:[%s3196_s15 + $0xe0] sm:$0xff] %v512_v28  ;;  %v520_v32 = vld [vmem:[%s3188_s14 + $0x200] sm:$0xff]  ;;  %v522_v33 = vld [vmem:[%s3188_s14 + $0x208] sm:$0xff] }
  0x1f   : > { %515 = vst [vmem:[%s3196_s15 + $0xe8] sm:$0xff] %v514_v29  ;;  %517 = vst [vmem:[%s3196_s15 + $0xf0] sm:$0xff] %v516_v30  ;;  %v524_v34 = vld [vmem:[%s3188_s14 + $0x210] sm:$0xff]  ;;  %v526_v35 = vld [vmem:[%s3188_s14 + $0x218] sm:$0xff] }
  0x20   : > { %519 = vst [vmem:[%s3196_s15 + $0xf8] sm:$0xff] %v518_v31  ;;  %521 = vst [vmem:[%s3196_s15 + $0x100] sm:$0xff] %v520_v32  ;;  %v528_v36 = vld [vmem:[%s3188_s14 + $0x220] sm:$0xff]  ;;  %v530_v37 = vld [vmem:[%s3188_s14 + $0x228] sm:$0xff] }
  0x21   : > { %523 = vst [vmem:[%s3196_s15 + $0x108] sm:$0xff] %v522_v33  ;;  %525 = vst [vmem:[%s3196_s15 + $0x110] sm:$0xff] %v524_v34  ;;  %v532_v38 = vld [vmem:[%s3188_s14 + $0x230] sm:$0xff]  ;;  %v534_v39 = vld [vmem:[%s3188_s14 + $0x238] sm:$0xff] }
  0x22   : > { %527 = vst [vmem:[%s3196_s15 + $0x118] sm:$0xff] %v526_v35  ;;  %529 = vst [vmem:[%s3196_s15 + $0x120] sm:$0xff] %v528_v36  ;;  %v536_v40 = vld [vmem:[%s3188_s14 + $0x240] sm:$0xff]  ;;  %v538_v41 = vld [vmem:[%s3188_s14 + $0x248] sm:$0xff] }
  0x23   : > { %531 = vst [vmem:[%s3196_s15 + $0x128] sm:$0xff] %v530_v37  ;;  %533 = vst [vmem:[%s3196_s15 + $0x130] sm:$0xff] %v532_v38  ;;  %v540_v42 = vld [vmem:[%s3188_s14 + $0x250] sm:$0xff]  ;;  %v542_v43 = vld [vmem:[%s3188_s14 + $0x258] sm:$0xff] }
  0x24   : > { %535 = vst [vmem:[%s3196_s15 + $0x138] sm:$0xff] %v534_v39  ;;  %537 = vst [vmem:[%s3196_s15 + $0x140] sm:$0xff] %v536_v40  ;;  %v544_v44 = vld [vmem:[%s3188_s14 + $0x260] sm:$0xff]  ;;  %v546_v45 = vld [vmem:[%s3188_s14 + $0x268] sm:$0xff] }
  0x25   : > { %539 = vst [vmem:[%s3196_s15 + $0x148] sm:$0xff] %v538_v41  ;;  %541 = vst [vmem:[%s3196_s15 + $0x150] sm:$0xff] %v540_v42  ;;  %v548_v46 = vld [vmem:[%s3188_s14 + $0x270] sm:$0xff]  ;;  %v550_v47 = vld [vmem:[%s3188_s14 + $0x278] sm:$0xff] }
  0x26   : > { %543 = vst [vmem:[%s3196_s15 + $0x158] sm:$0xff] %v542_v43  ;;  %545 = vst [vmem:[%s3196_s15 + $0x160] sm:$0xff] %v544_v44  ;;  %v552_v48 = vld [vmem:[%s3188_s14 + $0x280] sm:$0xff]  ;;  %v554_v49 = vld [vmem:[%s3188_s14 + $0x288] sm:$0xff] }
  0x27   : > { %547 = vst [vmem:[%s3196_s15 + $0x168] sm:$0xff] %v546_v45  ;;  %549 = vst [vmem:[%s3196_s15 + $0x170] sm:$0xff] %v548_v46  ;;  %v556_v50 = vld [vmem:[%s3188_s14 + $0x290] sm:$0xff]  ;;  %v558_v51 = vld [vmem:[%s3188_s14 + $0x298] sm:$0xff] }
  0x28   : > { %551 = vst [vmem:[%s3196_s15 + $0x178] sm:$0xff] %v550_v47  ;;  %553 = vst [vmem:[%s3196_s15 + $0x180] sm:$0xff] %v552_v48  ;;  %v560_v52 = vld [vmem:[%s3188_s14 + $0x2a0] sm:$0xff]  ;;  %v562_v53 = vld [vmem:[%s3188_s14 + $0x2a8] sm:$0xff] }
  0x29   : > { %555 = vst [vmem:[%s3196_s15 + $0x188] sm:$0xff] %v554_v49  ;;  %557 = vst [vmem:[%s3196_s15 + $0x190] sm:$0xff] %v556_v50  ;;  %v564_v54 = vld [vmem:[%s3188_s14 + $0x2b0] sm:$0xff]  ;;  %v566_v55 = vld [vmem:[%s3188_s14 + $0x2b8] sm:$0xff] }
  0x2a   : > { %559 = vst [vmem:[%s3196_s15 + $0x198] sm:$0xff] %v558_v51  ;;  %561 = vst [vmem:[%s3196_s15 + $0x1a0] sm:$0xff] %v560_v52  ;;  %v568_v56 = vld [vmem:[%s3188_s14 + $0x2c0] sm:$0xff]  ;;  %v570_v57 = vld [vmem:[%s3188_s14 + $0x2c8] sm:$0xff] }
  0x2b   : > { %563 = vst [vmem:[%s3196_s15 + $0x1a8] sm:$0xff] %v562_v53  ;;  %565 = vst [vmem:[%s3196_s15 + $0x1b0] sm:$0xff] %v564_v54  ;;  %v572_v58 = vld [vmem:[%s3188_s14 + $0x2d0] sm:$0xff]  ;;  %v574_v59 = vld [vmem:[%s3188_s14 + $0x2d8] sm:$0xff] }
  0x2c   : > { %567 = vst [vmem:[%s3196_s15 + $0x1b8] sm:$0xff] %v566_v55  ;;  %569 = vst [vmem:[%s3196_s15 + $0x1c0] sm:$0xff] %v568_v56  ;;  %v576_v60 = vld [vmem:[%s3188_s14 + $0x2e0] sm:$0xff]  ;;  %v578_v61 = vld [vmem:[%s3188_s14 + $0x2e8] sm:$0xff] }
  0x2d   : > { %571 = vst [vmem:[%s3196_s15 + $0x1c8] sm:$0xff] %v570_v57  ;;  %573 = vst [vmem:[%s3196_s15 + $0x1d0] sm:$0xff] %v572_v58  ;;  %v580_v62 = vld [vmem:[%s3188_s14 + $0x2f0] sm:$0xff]  ;;  %v582_v63 = vld [vmem:[%s3188_s14 + $0x2f8] sm:$0xff] }
  0x2e   : > { %575 = vst [vmem:[%s3196_s15 + $0x1d8] sm:$0xff] %v574_v59  ;;  %577 = vst [vmem:[%s3196_s15 + $0x1e0] sm:$0xff] %v576_v60  ;;  %v584_v0 = vld [vmem:[%s3188_s14 + $0x400] sm:$0xff]  ;;  %v586_v1 = vld [vmem:[%s3188_s14 + $0x408] sm:$0xff] }
  0x2f   : > { %579 = vst [vmem:[%s3196_s15 + $0x1e8] sm:$0xff] %v578_v61  ;;  %581 = vst [vmem:[%s3196_s15 + $0x1f0] sm:$0xff] %v580_v62  ;;  %v588_v2 = vld [vmem:[%s3188_s14 + $0x410] sm:$0xff]  ;;  %v590_v3 = vld [vmem:[%s3188_s14 + $0x418] sm:$0xff] }
  0x30   : > { %583 = vst [vmem:[%s3196_s15 + $0x1f8] sm:$0xff] %v582_v63  ;;  %585 = vst [vmem:[%s3196_s15 + $0x200] sm:$0xff] %v584_v0  ;;  %v592_v4 = vld [vmem:[%s3188_s14 + $0x420] sm:$0xff]  ;;  %v594_v5 = vld [vmem:[%s3188_s14 + $0x428] sm:$0xff] }
  0x31   : > { %587 = vst [vmem:[%s3196_s15 + $0x208] sm:$0xff] %v586_v1  ;;  %589 = vst [vmem:[%s3196_s15 + $0x210] sm:$0xff] %v588_v2  ;;  %v596_v6 = vld [vmem:[%s3188_s14 + $0x430] sm:$0xff]  ;;  %v598_v7 = vld [vmem:[%s3188_s14 + $0x438] sm:$0xff] }
  0x32   : > { %591 = vst [vmem:[%s3196_s15 + $0x218] sm:$0xff] %v590_v3  ;;  %593 = vst [vmem:[%s3196_s15 + $0x220] sm:$0xff] %v592_v4  ;;  %v600_v8 = vld [vmem:[%s3188_s14 + $0x440] sm:$0xff]  ;;  %v602_v9 = vld [vmem:[%s3188_s14 + $0x448] sm:$0xff] }
  0x33   : > { %595 = vst [vmem:[%s3196_s15 + $0x228] sm:$0xff] %v594_v5  ;;  %597 = vst [vmem:[%s3196_s15 + $0x230] sm:$0xff] %v596_v6  ;;  %v604_v10 = vld [vmem:[%s3188_s14 + $0x450] sm:$0xff]  ;;  %v606_v11 = vld [vmem:[%s3188_s14 + $0x458] sm:$0xff] }
  0x34   : > { %599 = vst [vmem:[%s3196_s15 + $0x238] sm:$0xff] %v598_v7  ;;  %601 = vst [vmem:[%s3196_s15 + $0x240] sm:$0xff] %v600_v8  ;;  %v608_v12 = vld [vmem:[%s3188_s14 + $0x460] sm:$0xff]  ;;  %v610_v13 = vld [vmem:[%s3188_s14 + $0x468] sm:$0xff] }
  0x35   : > { %603 = vst [vmem:[%s3196_s15 + $0x248] sm:$0xff] %v602_v9  ;;  %605 = vst [vmem:[%s3196_s15 + $0x250] sm:$0xff] %v604_v10  ;;  %v612_v14 = vld [vmem:[%s3188_s14 + $0x470] sm:$0xff]  ;;  %v614_v15 = vld [vmem:[%s3188_s14 + $0x478] sm:$0xff] }
  0x36   : > { %607 = vst [vmem:[%s3196_s15 + $0x258] sm:$0xff] %v606_v11  ;;  %609 = vst [vmem:[%s3196_s15 + $0x260] sm:$0xff] %v608_v12  ;;  %v616_v16 = vld [vmem:[%s3188_s14 + $0x480] sm:$0xff]  ;;  %v618_v17 = vld [vmem:[%s3188_s14 + $0x488] sm:$0xff] }
  0x37   : > { %611 = vst [vmem:[%s3196_s15 + $0x268] sm:$0xff] %v610_v13  ;;  %613 = vst [vmem:[%s3196_s15 + $0x270] sm:$0xff] %v612_v14  ;;  %v620_v18 = vld [vmem:[%s3188_s14 + $0x490] sm:$0xff]  ;;  %v622_v19 = vld [vmem:[%s3188_s14 + $0x498] sm:$0xff] }
  0x38   : > { %615 = vst [vmem:[%s3196_s15 + $0x278] sm:$0xff] %v614_v15  ;;  %617 = vst [vmem:[%s3196_s15 + $0x280] sm:$0xff] %v616_v16  ;;  %v624_v20 = vld [vmem:[%s3188_s14 + $0x4a0] sm:$0xff]  ;;  %v626_v21 = vld [vmem:[%s3188_s14 + $0x4a8] sm:$0xff] }
  0x39   : > { %619 = vst [vmem:[%s3196_s15 + $0x288] sm:$0xff] %v618_v17  ;;  %621 = vst [vmem:[%s3196_s15 + $0x290] sm:$0xff] %v620_v18  ;;  %v628_v22 = vld [vmem:[%s3188_s14 + $0x4b0] sm:$0xff]  ;;  %v630_v23 = vld [vmem:[%s3188_s14 + $0x4b8] sm:$0xff] }
  0x3a   : > { %623 = vst [vmem:[%s3196_s15 + $0x298] sm:$0xff] %v622_v19  ;;  %625 = vst [vmem:[%s3196_s15 + $0x2a0] sm:$0xff] %v624_v20  ;;  %v632_v24 = vld [vmem:[%s3188_s14 + $0x4c0] sm:$0xff]  ;;  %v634_v25 = vld [vmem:[%s3188_s14 + $0x4c8] sm:$0xff] }
  0x3b   : > { %627 = vst [vmem:[%s3196_s15 + $0x2a8] sm:$0xff] %v626_v21  ;;  %629 = vst [vmem:[%s3196_s15 + $0x2b0] sm:$0xff] %v628_v22  ;;  %v636_v26 = vld [vmem:[%s3188_s14 + $0x4d0] sm:$0xff]  ;;  %v638_v27 = vld [vmem:[%s3188_s14 + $0x4d8] sm:$0xff] }
  0x3c   : > { %631 = vst [vmem:[%s3196_s15 + $0x2b8] sm:$0xff] %v630_v23  ;;  %633 = vst [vmem:[%s3196_s15 + $0x2c0] sm:$0xff] %v632_v24  ;;  %v640_v28 = vld [vmem:[%s3188_s14 + $0x4e0] sm:$0xff]  ;;  %v642_v29 = vld [vmem:[%s3188_s14 + $0x4e8] sm:$0xff] }
  0x3d   : > { %635 = vst [vmem:[%s3196_s15 + $0x2c8] sm:$0xff] %v634_v25  ;;  %637 = vst [vmem:[%s3196_s15 + $0x2d0] sm:$0xff] %v636_v26  ;;  %v644_v30 = vld [vmem:[%s3188_s14 + $0x4f0] sm:$0xff]  ;;  %v646_v31 = vld [vmem:[%s3188_s14 + $0x4f8] sm:$0xff] }
  0x3e   : > { %639 = vst [vmem:[%s3196_s15 + $0x2d8] sm:$0xff] %v638_v27  ;;  %641 = vst [vmem:[%s3196_s15 + $0x2e0] sm:$0xff] %v640_v28 }
  0x3f   : > { %643 = vst [vmem:[%s3196_s15 + $0x2e8] sm:$0xff] %v642_v29  ;;  %645 = vst [vmem:[%s3196_s15 + $0x2f0] sm:$0xff] %v644_v30 }
  0x40   : > { %647 = vst [vmem:[%s3196_s15 + $0x2f8] sm:$0xff] %v646_v31 }
  0x41 PF: > { %p2548_p5 = scmp.ge.s32.totalorder %s3112_s26, 1  ;;  %p652_p6 = scmp.lt.s32.totalorder %s3112_s26, 3 }
  0x43   : > { %p653_p7 = pnand %p2548_p5, %p652_p6 }
  0x44   : > { %s659_s18 = sand.u32 (!%p653_p7), 1, %s3104_s24   ;;  %s2549_s30 = sshll.u32 (!%p653_p7), %s2542_s27, 5 }
  0x45   : > { %656 = sbr.rel (%p653_p7) target bundleno = 855 (0x357), region = 82  ;;  %p692_p8 = scmp.lt.s32.totalorder (!%p653_p7), %s2549_s30, 63 }
  0x46   : > { %s2927_s21 = smul.u32 (!%p653_p7), 768, %s659_s18 }
  0x48   : > { %s3399_s9 = scalar_lea.vmem (!%p653_p7), [#allocation2], %s2927_s21 }
  0x4a   : > { %v2952_v32 = vld [vmem:[%s4329_s1 + $0x18] sm:$0xff]   ;;  %v2953_v33 = vld [vmem:[%s4329_s1 + $0x8] sm:$0xff]   ;;  %v2954_v34 = vld [vmem:[%s4329_s1 + $0x10] sm:$0xff]   ;;  %vm816_vm0 = vcmask 261120   ;;  %vm1680_vm1 = vcmask 523264   ;;  %s4340_s30 = smov (!%p692_p8, %s2549_s30), 63 }
  0x4b   : > { %2778 = vmatprep.subr.bf16.mxu0 %v2952_v32  ;;  %2814 = vmatprep.subr.bf16.mxu1 %v2953_v33  ;;  %v2955_v35 = vld [vmem:[%s4329_s1] sm:$0xff]   ;;  %v2552_v37 = vld [vmem:[%s3399_s9 + $0x108] sm:$0xff]  ;;  %v2553_v41 = vld [vmem:[%s3399_s9 + $0x110] sm:$0xff] }
  0x4c   : > { %2779 = vmatpush3.bf16.msra.mxu0 %v2952_v32  ;;  %2815 = vmatpush3.bf16.msra.mxu1 %v2953_v33  ;;  %v2551_v36 = vld [vmem:[%s3399_s9 + $0x100] sm:$0xff]  ;;  %v699_v40 = vld [vmem:[%s3399_s9 + $0x8] sm:$0xff]  ;;  %v2554_v42 = vld [vmem:[%s3399_s9 + $0x118] sm:$0xff] }
  0x4d   : > { %2780 = vmatprep.subr.bf16.mxu0 %v2954_v34  ;;  %v698_v38 = vld [vmem:[%s3399_s9] sm:$0xff]  ;;  %2816 = vmatprep.subr.bf16.mxu1 %v2955_v35  ;;  %v783_v39 = vpack.c.bf16 %v2552_v37, %v2551_v36  ;;  %v784_v44 = vpack.c.bf16 %v2554_v42, %v2553_v41  ;;  %v700_v45 = vld [vmem:[%s3399_s9 + $0x10] sm:$0xff]  ;;  %v701_v46 = vld [vmem:[%s3399_s9 + $0x18] sm:$0xff] }
  0x4e   : > { %v730_v43 = vpack.c.bf16 %v699_v40, %v698_v38  ;;  %v731_v47 = vpack.c.bf16 %v701_v46, %v700_v45  ;;  %v2956_v48 = vld [vmem:[%s4329_s1 + $0x28] sm:$0xff]   ;;  %v2555_v49 = vld [vmem:[%s3399_s9 + $0x120] sm:$0xff]  ;;  %v2557_v55 = vld [vmem:[%s3399_s9 + $0x130] sm:$0xff] }
  0x4f   : > { %2782 = vmatprep.mubr.msk.bf16.mxu0 %vm816_vm0, %v783_v39  ;;  %v2556_v50 = vld [vmem:[%s3399_s9 + $0x128] sm:$0xff]  ;;  %v702_v51 = vld [vmem:[%s3399_s9 + $0x20] sm:$0xff]  ;;  %v2558_v56 = vld [vmem:[%s3399_s9 + $0x138] sm:$0xff] }
  0x50   : > { %2781 = vmatpush3.bf16.msra.mxu0 %v2954_v34  ;;  %2817 = vmatpush3.bf16.msra.mxu1 %v2955_v35  ;;  %v703_v52 = vld [vmem:[%s3399_s9 + $0x28] sm:$0xff]  ;;  %v785_v53 = vpack.c.bf16 %v2556_v50, %v2555_v49  ;;  %v704_v57 = vld [vmem:[%s3399_s9 + $0x30] sm:$0xff]  ;;  %v705_v58 = vld [vmem:[%s3399_s9 + $0x38] sm:$0xff]  ;;  %v786_v63 = vpack.c.bf16 %v2558_v56, %v2557_v55 }
  0x51   : > { %2818 = vmatprep.mubr.msk.bf16.mxu1 %vm816_vm0, %v730_v43  ;;  %2850 = vmatprep.subr.bf16.mxu0 %v2956_v48  ;;  %v732_v54 = vpack.c.bf16 %v703_v52, %v702_v51  ;;  %v2559_v59 = vld [vmem:[%s3399_s9 + $0x140] sm:$0xff]  ;;  %v2560_v60 = vld [vmem:[%s3399_s9 + $0x148] sm:$0xff]  ;;  %v733_v0 = vpack.c.bf16 %v705_v58, %v704_v57  ;;  %v2561_v3 = vld [vmem:[%s3399_s9 + $0x150] sm:$0xff] }
  0x52   : > { %v706_v61 = vld [vmem:[%s3399_s9 + $0x40] sm:$0xff]  ;;  %v707_v62 = vld [vmem:[%s3399_s9 + $0x48] sm:$0xff]  ;;  %v787_v1 = vpack.c.bf16 %v2560_v60, %v2559_v59  ;;  %v2562_v4 = vld [vmem:[%s3399_s9 + $0x158] sm:$0xff] }
  0x53   : > { %2783 = vmatmul.mubr.msk.bf16.vlgmr.msra.gmra.mxu0 %vm816_vm0, %v784_v44  ;;  %2819 = vmatmul.mubr.msk.bf16.vlgmr.msra.gmra.mxu1 %vm816_vm0, %v731_v47  ;;  %v734_v2 = vpack.c.bf16 %v707_v62, %v706_v61  ;;  %v708_v5 = vld [vmem:[%s3399_s9 + $0x50] sm:$0xff]  ;;  %v2957_v6 = vld [vmem:[%s4329_s1 + $0x20] sm:$0xff]   ;;  %v709_v7 = vld [vmem:[%s3399_s9 + $0x58] sm:$0xff]  ;;  %v788_v12 = vpack.c.bf16 %v2562_v4, %v2561_v3 }
  0x54   : > { %2851 = vmatpush3.bf16.msra.mxu0 %v2956_v48  ;;  %2786 = vmatprep.mubr.msk.bf16.mxu0 %vm816_vm0, %v785_v53  ;;  %v2563_v8 = vld [vmem:[%s3399_s9 + $0x160] sm:$0xff]  ;;  %v2564_v9 = vld [vmem:[%s3399_s9 + $0x168] sm:$0xff]  ;;  %v735_v13 = vpack.c.bf16 %v709_v7, %v708_v5  ;;  %v2565_v16 = vld [vmem:[%s3399_s9 + $0x170] sm:$0xff] }
  0x55   : > { %2822 = vmatprep.mubr.msk.bf16.mxu1 %vm816_vm0, %v732_v54  ;;  %v710_v10 = vld [vmem:[%s3399_s9 + $0x60] sm:$0xff]  ;;  %v711_v11 = vld [vmem:[%s3399_s9 + $0x68] sm:$0xff]  ;;  %2852 = vmatprep.subr.bf16.mxu0 %v2957_v6  ;;  %v789_v14 = vpack.c.bf16 %v2564_v9, %v2563_v8  ;;  %v2566_v17 = vld [vmem:[%s3399_s9 + $0x178] sm:$0xff] }
  0x56   : > { %v736_v15 = vpack.c.bf16 %v711_v11, %v710_v10  ;;  %v712_v18 = vld [vmem:[%s3399_s9 + $0x70] sm:$0xff]  ;;  %v713_v19 = vld [vmem:[%s3399_s9 + $0x78] sm:$0xff]  ;;  %v2567_v20 = vld [vmem:[%s3399_s9 + $0x180] sm:$0xff]  ;;  %v790_v24 = vpack.c.bf16 %v2566_v17, %v2565_v16 }
  0x57   : > { %v2568_v21 = vld [vmem:[%s3399_s9 + $0x188] sm:$0xff]  ;;  %v714_v22 = vld [vmem:[%s3399_s9 + $0x80] sm:$0xff]  ;;  %v737_v25 = vpack.c.bf16 %v713_v19, %v712_v18  ;;  %v2569_v28 = vld [vmem:[%s3399_s9 + $0x190] sm:$0xff] }
  0x58   : > { %2853 = vmatpush3.bf16.msra.mxu0 %v2957_v6  ;;  %v715_v23 = vld [vmem:[%s3399_s9 + $0x88] sm:$0xff]  ;;  %v791_v26 = vpack.c.bf16 %v2568_v21, %v2567_v20  ;;  %v2570_v29 = vld [vmem:[%s3399_s9 + $0x198] sm:$0xff]  ;;  %v716_v30 = vld [vmem:[%s3399_s9 + $0x90] sm:$0xff] }
  0x59   : > { %v738_v27 = vpack.c.bf16 %v715_v23, %v714_v22  ;;  %v717_v31 = vld [vmem:[%s3399_s9 + $0x98] sm:$0xff]  ;;  %v2571_v32 = vld [vmem:[%s3399_s9 + $0x1a0] sm:$0xff]  ;;  %v2572_v33 = vld [vmem:[%s3399_s9 + $0x1a8] sm:$0xff]  ;;  %v792_v36 = vpack.c.bf16 %v2570_v29, %v2569_v28 }
  0x5a   : > { %v718_v34 = vld [vmem:[%s3399_s9 + $0xa0] sm:$0xff]  ;;  %v719_v35 = vld [vmem:[%s3399_s9 + $0xa8] sm:$0xff]  ;;  %v739_v37 = vpack.c.bf16 %v717_v31, %v716_v30  ;;  %v793_v38 = vpack.c.bf16 %v2572_v33, %v2571_v32  ;;  %v2573_v40 = vld [vmem:[%s3399_s9 + $0x1b0] sm:$0xff] }
  0x5b   : > { %2787 = vmatmul.mubr.msk.bf16.gmra.mxu0 %vm816_vm0, %v786_v63  ;;  %2823 = vmatmul.mubr.msk.bf16.gmra.mxu1 %vm816_vm0, %v733_v0  ;;  %v740_v39 = vpack.c.bf16 %v719_v35, %v718_v34  ;;  %v2574_v41 = vld [vmem:[%s3399_s9 + $0x1b8] sm:$0xff]  ;;  %v720_v42 = vld [vmem:[%s3399_s9 + $0xb0] sm:$0xff]  ;;  %v2575_v44 = vld [vmem:[%s3399_s9 + $0x1c0] sm:$0xff] }
  0x5c   : > { %2790 = vmatprep.mubr.msk.bf16.mxu0 %vm816_vm0, %v787_v1  ;;  %2826 = vmatprep.mubr.msk.bf16.mxu1 %vm816_vm0, %v734_v2  ;;  %v721_v43 = vld [vmem:[%s3399_s9 + $0xb8] sm:$0xff]  ;;  %v2576_v45 = vld [vmem:[%s3399_s9 + $0x1c8] sm:$0xff]  ;;  %v722_v46 = vld [vmem:[%s3399_s9 + $0xc0] sm:$0xff]  ;;  %v794_v48 = vpack.c.bf16 %v2574_v41, %v2573_v40 }
  0x5d   : > { %v723_v47 = vld [vmem:[%s3399_s9 + $0xc8] sm:$0xff]  ;;  %v741_v49 = vpack.c.bf16 %v721_v43, %v720_v42  ;;  %v795_v50 = vpack.c.bf16 %v2576_v45, %v2575_v44  ;;  %v2577_v52 = vld [vmem:[%s3399_s9 + $0x1d0] sm:$0xff]  ;;  %v2578_v53 = vld [vmem:[%s3399_s9 + $0x1d8] sm:$0xff] }
  0x5e   : > { %v742_v51 = vpack.c.bf16 %v723_v47, %v722_v46  ;;  %v724_v54 = vld [vmem:[%s3399_s9 + $0xd0] sm:$0xff]  ;;  %v725_v55 = vld [vmem:[%s3399_s9 + $0xd8] sm:$0xff]  ;;  %v2579_v56 = vld [vmem:[%s3399_s9 + $0x1e0] sm:$0xff]  ;;  %v796_v60 = vpack.c.bf16 %v2578_v53, %v2577_v52 }
  0x5f   : > { %v2580_v57 = vld [vmem:[%s3399_s9 + $0x1e8] sm:$0xff]  ;;  %v726_v58 = vld [vmem:[%s3399_s9 + $0xe0] sm:$0xff]  ;;  %v743_v61 = vpack.c.bf16 %v725_v55, %v724_v54  ;;  %v2581_v0 = vld [vmem:[%s3399_s9 + $0x1f0] sm:$0xff] }
  0x60   : > { %v727_v59 = vld [vmem:[%s3399_s9 + $0xe8] sm:$0xff]  ;;  %v797_v62 = vpack.c.bf16 %v2580_v57, %v2579_v56  ;;  %v2582_v1 = vld [vmem:[%s3399_s9 + $0x1f8] sm:$0xff]  ;;  %v728_v2 = vld [vmem:[%s3399_s9 + $0xf0] sm:$0xff] }
  0x61   : > { %v744_v63 = vpack.c.bf16 %v727_v59, %v726_v58  ;;  %v729_v3 = vld [vmem:[%s3399_s9 + $0xf8] sm:$0xff]  ;;  %v2623_v4 = vld [vmem:[%s3399_s9 + $0x200] sm:$0xff]  ;;  %v2624_v5 = vld [vmem:[%s3399_s9 + $0x208] sm:$0xff]  ;;  %v798_v6 = vpack.c.bf16 %v2582_v1, %v2581_v0 }
  0x62   : > { %v745_v7 = vpack.c.bf16 %v729_v3, %v728_v2  ;;  %v1280_v8 = vpack.c.bf16 %v2624_v5, %v2623_v4  ;;  %v2625_v9 = vld [vmem:[%s3399_s9 + $0x210] sm:$0xff]  ;;  %v2626_v10 = vld [vmem:[%s3399_s9 + $0x218] sm:$0xff]  ;;  %v2627_v11 = vld [vmem:[%s3399_s9 + $0x220] sm:$0xff] }
  0x63   : > { %2791 = vmatmul.mubr.msk.bf16.gmra.mxu0 %vm816_vm0, %v788_v12  ;;  %2827 = vmatmul.mubr.msk.bf16.gmra.mxu1 %vm816_vm0, %v735_v13  ;;  %v2628_v12 = vld [vmem:[%s3399_s9 + $0x228] sm:$0xff]  ;;  %v1281_v13 = vpack.c.bf16 %v2626_v10, %v2625_v9  ;;  %v2630_v16 = vld [vmem:[%s3399_s9 + $0x238] sm:$0xff]  ;;  %v2631_v17 = vld [vmem:[%s3399_s9 + $0x240] sm:$0xff] }
  0x64   : > { %2794 = vmatprep.mubr.msk.bf16.mxu0 %vm816_vm0, %v789_v14  ;;  %2830 = vmatprep.mubr.msk.bf16.mxu1 %vm816_vm0, %v736_v15  ;;  %v1282_v14 = vpack.c.bf16 %v2628_v12, %v2627_v11  ;;  %v2629_v15 = vld [vmem:[%s3399_s9 + $0x230] sm:$0xff]  ;;  %v2632_v18 = vld [vmem:[%s3399_s9 + $0x248] sm:$0xff]  ;;  %v2634_v22 = vld [vmem:[%s3399_s9 + $0x258] sm:$0xff] }
  0x65   : > { %v1283_v19 = vpack.c.bf16 %v2630_v16, %v2629_v15  ;;  %v1284_v20 = vpack.c.bf16 %v2632_v18, %v2631_v17  ;;  %v2633_v21 = vld [vmem:[%s3399_s9 + $0x250] sm:$0xff]  ;;  %v2635_v23 = vld [vmem:[%s3399_s9 + $0x260] sm:$0xff]  ;;  %v2638_v28 = vld [vmem:[%s3399_s9 + $0x278] sm:$0xff] }
  0x66   : > { %v2639_v29 = vld [vmem:[%s3399_s9 + $0x280] sm:$0xff]  ;;  %v2640_v30 = vld [vmem:[%s3399_s9 + $0x288] sm:$0xff]  ;;  %v2641_v33 = vld [vmem:[%s3399_s9 + $0x290] sm:$0xff] }
  0x67   : > { %v1288_v32 = vpack.c.bf16 %v2640_v30, %v2639_v29  ;;  %v2642_v34 = vld [vmem:[%s3399_s9 + $0x298] sm:$0xff]  ;;  %v2643_v35 = vld [vmem:[%s3399_s9 + $0x2a0] sm:$0xff]  ;;  %v2645_v40 = vld [vmem:[%s3399_s9 + $0x2b0] sm:$0xff] }
  0x68   : > { %v2646_v41 = vld [vmem:[%s3399_s9 + $0x2b8] sm:$0xff]  ;;  %v2647_v42 = vld [vmem:[%s3399_s9 + $0x2c0] sm:$0xff]  ;;  %v2648_v43 = vld [vmem:[%s3399_s9 + $0x2c8] sm:$0xff] }
  0x69   : > { %v1291_v44 = vpack.c.bf16 %v2646_v41, %v2645_v40  ;;  %v1292_v45 = vpack.c.bf16 %v2648_v43, %v2647_v42  ;;  %v2649_v46 = vld [vmem:[%s3399_s9 + $0x2d0] sm:$0xff]  ;;  %v2650_v47 = vld [vmem:[%s3399_s9 + $0x2d8] sm:$0xff]  ;;  %v2960_v56 = vld [vmem:[%s4331_s3 + $0x8] sm:$0xff]  }
  0x6a   : > { %v2959_v52 = vld [vmem:[%s4331_s3 + $0x10] sm:$0xff]   ;;  %v2654_v54 = vld [vmem:[%s3399_s9 + $0x2f8] sm:$0xff]  ;;  %v2961_v57 = vld [vmem:[%s4331_s3] sm:$0xff]  }
  0x6b   : > { %2795 = vmatmul.mubr.msk.bf16.gmra.mxu0 %vm816_vm0, %v790_v24  ;;  %2831 = vmatmul.mubr.msk.bf16.gmra.mxu1 %vm816_vm0, %v737_v25  ;;  %v2636_v24 = vld [vmem:[%s3399_s9 + $0x268] sm:$0xff]  ;;  %v1285_v25 = vpack.c.bf16 %v2634_v22, %v2633_v21  ;;  %v2653_v53 = vld [vmem:[%s3399_s9 + $0x2f0] sm:$0xff] }
  0x6c   : > { %2798 = vmatprep.mubr.msk.bf16.mxu0 %vm816_vm0, %v791_v26  ;;  %2834 = vmatprep.mubr.msk.bf16.mxu1 %vm816_vm0, %v738_v27  ;;  %v1286_v26 = vpack.c.bf16 %v2636_v24, %v2635_v23  ;;  %v2637_v27 = vld [vmem:[%s3399_s9 + $0x270] sm:$0xff]  ;;  %v1295_v55 = vpack.c.bf16 %v2654_v54, %v2653_v53 }
  0x6d   : > { %v1287_v31 = vpack.c.bf16 %v2638_v28, %v2637_v27 }
  0x73   : > { %2799 = vmatmul.mubr.msk.bf16.gmra.mxu0 %vm816_vm0, %v792_v36  ;;  %2835 = vmatmul.mubr.msk.bf16.gmra.mxu1 %vm816_vm0, %v739_v37  ;;  %v2644_v36 = vld [vmem:[%s3399_s9 + $0x2a8] sm:$0xff]  ;;  %v1289_v37 = vpack.c.bf16 %v2642_v34, %v2641_v33 }
  0x74   : > { %2802 = vmatprep.mubr.msk.bf16.mxu0 %vm816_vm0, %v793_v38  ;;  %2838 = vmatprep.mubr.msk.bf16.mxu1 %vm816_vm0, %v740_v39  ;;  %v1290_v38 = vpack.c.bf16 %v2644_v36, %v2643_v35  ;;  %v2958_v39 = vld [vmem:[%s4331_s3 + $0x18] sm:$0xff]  }
  0x75   : > { %2886 = vmatprep.subr.bf16.mxu1 %v2958_v39 }
  0x76   : > { %2887 = vmatpush3.bf16.msra.mxu1 %v2958_v39 }
  0x77   : > { %2888 = vmatprep.subr.bf16.mxu1 %v2959_v52 }
  0x7a   : > { %2889 = vmatpush3.bf16.msra.mxu1 %v2959_v52 }
  0x7b   : > { %2803 = vmatmul.mubr.msk.bf16.gmra.mxu0 %vm816_vm0, %v794_v48  ;;  %2839 = vmatmul.mubr.msk.bf16.gmra.mxu1 %vm816_vm0, %v741_v49  ;;  %v2651_v48 = vld [vmem:[%s3399_s9 + $0x2e0] sm:$0xff]  ;;  %v2652_v49 = vld [vmem:[%s3399_s9 + $0x2e8] sm:$0xff]  ;;  %s2550_s9 = sshll.u32 %s4340_s30, 3 }
  0x7c   : > { %2806 = vmatprep.mubr.msk.bf16.mxu0 %vm816_vm0, %v795_v50  ;;  %2842 = vmatprep.mubr.msk.bf16.mxu1 %vm816_vm0, %v742_v51  ;;  %v1293_v50 = vpack.c.bf16 %v2650_v47, %v2649_v46  ;;  %v1294_v51 = vpack.c.bf16 %v2652_v49, %v2651_v48  ;;  %v3636_v47 = vld [vmem:[%s4330_s2] ss:$0 sm:$0xff]  ;;  %s4046_s13 = scalar_lea.vmem %s4335_s7, %s2550_s9 }
  0x7d   : > { %2890 = vmatprep.subr.bf16.mxu1 %v2960_v56 }
  0x7e   : > { %2891 = vmatpush3.bf16.msra.mxu1 %v2960_v56 }
  0x7f   : > { %2892 = vmatprep.subr.bf16.mxu1 %v2961_v57 }
  0x82   : > { %2893 = vmatpush3.bf16.msra.mxu1 %v2961_v57 }
  0x83   : > { %2807 = vmatmul.mubr.msk.bf16.gmra.mxu0 %vm816_vm0, %v796_v60  ;;  %2843 = vmatmul.mubr.msk.bf16.gmra.mxu1 %vm816_vm0, %v743_v61 }
  0x84   : > { %2810 = vmatprep.mubr.msk.bf16.mxu0 %vm816_vm0, %v797_v62  ;;  %2846 = vmatprep.mubr.msk.bf16.mxu1 %vm816_vm0, %v744_v63 }
  0x8b   : > { %2811 = vmatmul.mubr.msk.bf16.gmra.mxu0 %vm816_vm0, %v798_v6  ;;  %2847 = vmatmul.mubr.msk.bf16.gmra.mxu1 %vm816_vm0, %v745_v7 }
  0x8c   : > { %2854 = vmatprep.mubr.msk.bf16.mxu0 %vm816_vm0, %v1280_v8 }
  0x93   : > { %2855 = vmatmul.mubr.msk.bf16.vlgmr.msra.gmra.mxu0 %vm816_vm0, %v1281_v13 }
  0x94   : > { %2858 = vmatprep.mubr.msk.bf16.mxu0 %vm816_vm0, %v1282_v14 }
  0x9b   : > { %2859 = vmatmul.mubr.msk.bf16.gmra.mxu0 %vm816_vm0, %v1283_v19 }
  0x9c   : > { %2862 = vmatprep.mubr.msk.bf16.mxu0 %vm816_vm0, %v1284_v20 }
  0xa3   : > { %2863 = vmatmul.mubr.msk.bf16.gmra.mxu0 %vm816_vm0, %v1285_v25 }
  0xa4   : > { %2866 = vmatprep.mubr.msk.bf16.mxu0 %vm816_vm0, %v1286_v26 }
  0xab   : > { %2867 = vmatmul.mubr.msk.bf16.gmra.mxu0 %vm816_vm0, %v1287_v31 }
  0xac   : > { %2870 = vmatprep.mubr.msk.bf16.mxu0 %vm816_vm0, %v1288_v32 }
  0xb3   : > { %2871 = vmatmul.mubr.msk.bf16.gmra.mxu0 %vm816_vm0, %v1289_v37 }
  0xb4   : > { %2874 = vmatprep.mubr.msk.bf16.mxu0 %vm816_vm0, %v1290_v38 }
  0xbb   : > { %2875 = vmatmul.mubr.msk.bf16.gmra.mxu0 %vm816_vm0, %v1291_v44 }
  0xbc   : > { %2878 = vmatprep.mubr.msk.bf16.mxu0 %vm816_vm0, %v1292_v45 }
  0xc3   : > { %2879 = vmatmul.mubr.msk.bf16.gmra.mxu0 %vm816_vm0, %v1293_v50 }
  0xc4   : > { %2882 = vmatprep.mubr.msk.bf16.mxu0 %vm816_vm0, %v1294_v51 }
  0xcb   : > { %2883 = vmatmul.mubr.msk.bf16.gmra.mxu0 %vm816_vm0, %v1295_v55 }
 0x113   : > { %v2784_v58 = vpop.f32.mrf.mxu0  ;;  %v2820_v59 = vpop.f32.mrf.mxu1 }
 0x114   : > { %v1129_v43 = vadd.f32 %v2820_v59, %v2784_v58 }
 0x115   : > { %v899_v60 = vpop.f32.mrf.mxu0  ;;  %v1120_v61 = vpop.f32.mrf.mxu1 }
 0x116   : > { %v1121_v45 = vadd.f32 %v1120_v61, %v899_v60 }
 0x117   : > { %v2785_v62 = vpop.f32.mrf.mxu0  ;;  %v2821_v63 = vpop.f32.mrf.mxu1 }
 0x118   : > { %v1132_v50 = vadd.f32 %v2821_v63, %v2785_v62 }
 0x119   : > { %v902_v0 = vpop.f32.mrf.mxu0  ;;  %v1123_v2 = vpop.f32.mrf.mxu1 }
 0x11a   : > { %v1124_v54 = vadd.f32 %v1123_v2, %v902_v0 }
 0x11b   : > { %v2788_v1 = vpop.f32.mrf.mxu0  ;;  %v2824_v5 = vpop.f32.mrf.mxu1 }
 0x11c   : > { %v1145_v59 = vadd.f32 %v2824_v5, %v2788_v1 }
 0x11d   : > { %v915_v3 = vpop.f32.mrf.mxu0  ;;  %v1136_v8 = vpop.f32.mrf.mxu1 }
 0x11f   : > { %v3563_v4 = vpop.f32.mrf.mxu0  ;;  %v2825_v11 = vpop.f32.mrf.mxu1 }
 0x120   : > { %v1148_v2 = vadd.f32 %v2825_v11, %v3563_v4 }
 0x121   : > { %v3565_v6 = vpop.f32.mrf.mxu0  ;;  %v1139_v14 = vpop.f32.mrf.mxu1 }
 0x123   : > { %v3567_v7 = vpop.f32.mrf.mxu0  ;;  %v3581_v17 = vpop.f32.mrf.mxu1 }
 0x125   : > { %v3569_v9 = vpop.f32.mrf.mxu0  ;;  %v3587_v20 = vpop.f32.mrf.mxu1 }
 0x126   : > { %v1153_v11 = vadd.f32 %v3587_v20, %v3569_v9 }
 0x127   : > { %v3571_v10 = vpop.f32.mrf.mxu0  ;;  %v3593_v23 = vpop.f32.mrf.mxu1 }
 0x129   : > { %v3573_v12 = vpop.f32.mrf.mxu0  ;;  %v3599_v26 = vpop.f32.mrf.mxu1 }
 0x12a   : > { %v1156_v9 = vadd.f32 %v3599_v26, %v3573_v12 }
 0x12b   : > { %v3575_v13 = vpop.f32.mrf.mxu0  ;;  %v3605_v29 = vpop.f32.mrf.mxu1 }
 0x12d   : > { %v3577_v15 = vpop.f32.mrf.mxu0  ;;  %v3611_v32 = vpop.f32.mrf.mxu1 }
 0x12f   : > { %v3579_v16 = vpop.f32.mrf.mxu0  ;;  %v3617_v35 = vpop.f32.mrf.mxu1 }
 0x131   : > { %v3583_v18 = vpop.f32.mrf.mxu0  ;;  %v3623_v38 = vpop.f32.mrf.mxu1 }
 0x133   : > { %v3585_v19 = vpop.f32.mrf.mxu0  ;;  %v3629_v41 = vpop.f32.mrf.mxu1 }
 0x135   : > { %v3589_v21 = vpop.f32.mrf.mxu0  ;;  %v3638_v48 = vpop.f32.mrf.mxu1 }
 0x137   : > { %v3591_v22 = vpop.f32.mrf.mxu0  ;;  %v3641_v56 = vpop.f32.mrf.mxu1 }
 0x139   : > { %v3595_v24 = vpop.f32.mrf.mxu0 }
 0x13b   : > { %v3597_v25 = vpop.f32.mrf.mxu0 }
 0x13d   : > { %v3601_v27 = vpop.f32.mrf.mxu0 }
 0x13f   : > { %v3603_v28 = vpop.f32.mrf.mxu0 }
 0x141   : > { %v3607_v30 = vpop.f32.mrf.mxu0 }
 0x143   : > { %v3609_v31 = vpop.f32.mrf.mxu0 }
 0x145   : > { %v3613_v33 = vpop.f32.mrf.mxu0 }
 0x147   : > { %v3615_v34 = vpop.f32.mrf.mxu0 }
 0x149   : > { %v3619_v36 = vpop.f32.mrf.mxu0 }
 0x14b   : > { %v3621_v37 = vpop.f32.mrf.mxu0 }
 0x14d   : > { %v3625_v39 = vpop.f32.mrf.mxu0 }
 0x14f   : > { %v3627_v40 = vpop.f32.mrf.mxu0 }
 0x151   : > { %v3631_v42 = vpop.f32.mrf.mxu0 }
 0x153   : > { %v2856_v44 = vpop.f32.mrf.mxu0 }
 0x154   : > { %v1524_v46 = vadd.f32 %v2856_v44, %v1129_v43  ;;  %v1137_v44 = vadd.f32 %v1136_v8, %v915_v3 }
 0x155   : > { %v1395_v49 = vpop.f32.mrf.mxu0 }
 0x156   : > { %v1522_v51 = vadd.f32 %v1395_v49, %v1121_v45  ;;  %v1563_v52 = vadd.f32 %v3636_v47, %v1524_v46  ;;  %v3646_v45 = vpop.f32.mrf.mxu1  ;;  %v1140_v49 = vadd.f32 %v1139_v14, %v3565_v6 }
 0x157   : > { %v2857_v53 = vpop.f32.mrf.mxu0 }
 0x158   : > { %v1525_v55 = vadd.f32 %v2857_v53, %v1132_v50  ;;  %v1561_v57 = vadd.f32 %v3636_v47, %v1522_v51  ;;  %2962 = vtanh.f32 %v1563_v52  ;;  %v3651_v51 = vpop.f32.mrf.mxu1  ;;  %v1161_v52 = vadd.f32 %v3581_v17, %v3567_v7 }
 0x159   : > { %v1398_v58 = vpop.f32.mrf.mxu0 }
 0x15a   : > { %v1564_v60 = vadd.f32 %v3636_v47, %v1525_v55  ;;  %v1523_v61 = vadd.f32 %v1398_v58, %v1124_v54  ;;  %v3660_v55 = vpop.f32.mrf.mxu1  ;;  %v1164_v58 = vadd.f32 %v3593_v23, %v3571_v10  ;;  %v1177_v10 = vadd.f32 %v3605_v29, %v3575_v13 }
 0x15b   : > { %v2860_v43 = vpop.f32.mrf.mxu0  ;;  %v1180_v29 = vadd.f32 %v3617_v35, %v3579_v16 }
 0x15c   : > { %2964 = vtanh.f32 %v1564_v60  ;;  %v1562_v62 = vadd.f32 %v3636_v47, %v1523_v61  ;;  %v1528_v63 = vadd.f32 %v2860_v43, %v1145_v59  ;;  %v3667_v43 = vpop.f32.mrf.mxu1 }
 0x15d   : > { %2966 = vtanh.f32 %v1561_v57  ;;  %v1411_v0 = vpop.f32.mrf.mxu0 }
 0x15e   : > { %2968 = vtanh.f32 %v1562_v62  ;;  %v1526_v46 = vadd.f32 %v1411_v0, %v1137_v44  ;;  %v1567_v1 = vadd.f32 %v3636_v47, %v1528_v63 }
 0x15f   : > { %v2861_v5 = vpop.f32.mrf.mxu0 }
 0x160   : > { %v1529_v50 = vadd.f32 %v2861_v5, %v1148_v2  ;;  %v1565_v3 = vadd.f32 %v3636_v47, %v1526_v46  ;;  %2970 = vtanh.f32 %v1567_v1  ;;  %v1169_v1 = vadd.f32 %v3611_v32, %v3577_v15 }
 0x161   : > { %v1414_v8 = vpop.f32.mrf.mxu0 }
 0x162   : > { %v1568_v53 = vadd.f32 %v3636_v47, %v1529_v50  ;;  %v1527_v54 = vadd.f32 %v1414_v8, %v1140_v49  ;;  %v3676_v50 = vpop.f32.mrf.mxu1 }
 0x163   : > { %v2864_v4 = vpop.f32.mrf.mxu0 }
 0x164   : > { %2972 = vtanh.f32 %v1568_v53  ;;  %v1566_v6 = vadd.f32 %v3636_v47, %v1527_v54  ;;  %v1532_v14 = vadd.f32 %v2864_v4, %v1161_v52  ;;  %v1172_v52 = vadd.f32 %v3623_v38, %v3583_v18  ;;  %v3685_v4 = vpop.f32.mrf.mxu1 }
 0x165   : > { %2974 = vtanh.f32 %v1565_v3  ;;  %v1427_v57 = vpop.f32.mrf.mxu0  ;;  %v2963_v60 = vpop.eup %2962 }
 0x166   : > { %2976 = vtanh.f32 %v1566_v6  ;;  %v1530_v7 = vadd.f32 %v1427_v57, %v1153_v11  ;;  %v1571_v17 = vadd.f32 %v3636_v47, %v1532_v14  ;;  %v1193_v6 = vadd.f32 %v3629_v41, %v3585_v19 }
 0x167   : > { %v2865_v59 = vpop.f32.mrf.mxu0  ;;  %v1196_v19 = vadd.f32 %v3641_v56, %v3591_v22  ;;  %v1209_v56 = vadd.f32 %v3651_v51, %v3597_v25  ;;  %v1212_v25 = vadd.f32 %v3667_v43, %v3603_v28  ;;  %v1225_v43 = vadd.f32 %v3685_v4, %v3609_v31 }
 0x168   : > { %v1533_v20 = vadd.f32 %v2865_v59, %v1164_v58  ;;  %v1569_v44 = vadd.f32 %v3636_v47, %v1530_v7  ;;  %2978 = vtanh.f32 %v1571_v17  ;;  %v1185_v17 = vadd.f32 %v3638_v48, %v3589_v21 }
 0x169   : > { %v2965_v61 = vpop.eup %2964  ;;  %v1430_v62 = vpop.f32.mrf.mxu0 }
 0x16a   : > { %v2967_v63 = vpop.eup %2966  ;;  %v1626_v23 = vpack.c.bf16 %v2965_v61, %v2963_v60  ;;  %v1572_v0 = vadd.f32 %v3636_v47, %v1533_v20  ;;  %v1531_v2 = vadd.f32 %v1430_v62, %v1156_v9  ;;  %v1216_v9 = vpop.f32.mrf.mxu1 }
 0x16b   : > { %v2969_v46 = vpop.eup %2968  ;;  %v2868_v12 = vpop.f32.mrf.mxu0 }
 0x16c   : > { %2980 = vtanh.f32 %v1572_v0  ;;  %v1570_v26 = vadd.f32 %v3636_v47, %v1531_v2  ;;  %v1536_v5 = vadd.f32 %v2868_v12, %v1177_v10  ;;  %v1625_v49 = vpack.c.bf16 %v2969_v46, %v2967_v63  ;;  %v2845_v10 = vpop.f32.mrf.mxu1 }
 0x16d   : > { %2982 = vtanh.f32 %v1569_v44  ;;  %v1443_v13 = vpop.f32.mrf.mxu0  ;;  %v2971_v8 = vpop.eup %2970  ;;  %v1188_v44 = vadd.f32 %v3646_v45, %v3595_v24 }
 0x16e   : > { %2984 = vtanh.f32 %v1570_v26  ;;  %v1534_v3 = vadd.f32 %v1443_v13, %v1169_v1  ;;  %2894 = vmatprep.mubr.msk.bf16.mxu1 %vm1680_vm1, %v1625_v49  ;;  %v1575_v15 = vadd.f32 %v3636_v47, %v1536_v5  ;;  %v1201_v26 = vadd.f32 %v3660_v55, %v3601_v27  ;;  %v1219_v13 = vpop.f32.mrf.mxu1 }
 0x16f   : > { %v2869_v32 = vpop.f32.mrf.mxu0  ;;  %2895 = vmatmul.mubr.msk.bf16.vlgmr.msra.gmra.mxu1 %vm1680_vm1, %v1626_v23 }
 0x170   : > { %v1537_v53 = vadd.f32 %v2869_v32, %v1180_v29  ;;  %v1573_v11 = vadd.f32 %v3636_v47, %v1534_v3  ;;  %2986 = vtanh.f32 %v1575_v15  ;;  %v1204_v15 = vadd.f32 %v3676_v50, %v3607_v30 }
 0x171   : > { %v2973_v54 = vpop.eup %2972  ;;  %v1446_v16 = vpop.f32.mrf.mxu0 }
 0x172   : > { %v2975_v35 = vpop.eup %2974  ;;  %v1576_v14 = vadd.f32 %v3636_v47, %v1537_v53  ;;  %v1535_v57 = vadd.f32 %v1446_v16, %v1172_v52  ;;  %v1628_v58 = vpack.c.bf16 %v2973_v54, %v2971_v8  ;;  %v2848_v52 = vpop.f32.mrf.mxu1 }
 0x173   : > { %v2977_v7 = vpop.eup %2976  ;;  %v2872_v18 = vpop.f32.mrf.mxu0 }
 0x174   : > { %2988 = vtanh.f32 %v1576_v14  ;;  %v1574_v38 = vadd.f32 %v3636_v47, %v1535_v57  ;;  %v1540_v59 = vadd.f32 %v2872_v18, %v1193_v6  ;;  %v1627_v60 = vpack.c.bf16 %v2977_v7, %v2975_v35  ;;  %v1232_v7 = vpop.f32.mrf.mxu1 }
 0x175   : > { %2990 = vtanh.f32 %v1573_v11  ;;  %v1459_v20 = vpop.f32.mrf.mxu0  ;;  %v2979_v48 = vpop.eup %2978  ;;  %v1217_v14 = vadd.f32 %v1216_v9, %v3613_v33  ;;  %v1228_v18 = vadd.f32 %v2845_v10, %v3615_v34  ;;  %v1241_v34 = vadd.f32 %v2848_v52, %v3621_v37 }
 0x176   : > { %2992 = vtanh.f32 %v1574_v38  ;;  %v1538_v41 = vadd.f32 %v1459_v20, %v1185_v17  ;;  %2898 = vmatprep.mubr.msk.bf16.mxu1 %vm1680_vm1, %v1627_v60  ;;  %v1579_v61 = vadd.f32 %v3636_v47, %v1540_v59  ;;  %v1220_v59 = vadd.f32 %v1219_v13, %v3619_v36  ;;  %v2849_v20 = vpop.f32.mrf.mxu1 }
 0x177   : > { %v2873_v21 = vpop.f32.mrf.mxu0  ;;  %2899 = vmatmul.mubr.msk.bf16.gmra.mxu1 %vm1680_vm1, %v1628_v58 }
 0x178   : > { %v1541_v62 = vadd.f32 %v2873_v21, %v1196_v19  ;;  %v1577_v23 = vadd.f32 %v3636_v47, %v1538_v41  ;;  %2994 = vtanh.f32 %v1579_v61 }
 0x179   : > { %v2981_v63 = vpop.eup %2980  ;;  %v1462_v0 = vpop.f32.mrf.mxu0 }
 0x17a   : > { %v2983_v22 = vpop.eup %2982  ;;  %v1580_v2 = vadd.f32 %v3636_v47, %v1541_v62  ;;  %v1539_v46 = vadd.f32 %v1462_v0, %v1188_v44  ;;  %v1630_v1 = vpack.c.bf16 %v2981_v63, %v2979_v48  ;;  %v1233_v63 = vadd.f32 %v1232_v7, %v3625_v39 }
 0x17b   : > { %v2985_v12 = vpop.eup %2984  ;;  %v2876_v24 = vpop.f32.mrf.mxu0 }
 0x17c   : > { %2996 = vtanh.f32 %v1580_v2  ;;  %v1578_v45 = vadd.f32 %v3636_v47, %v1539_v46  ;;  %v1544_v5 = vadd.f32 %v2876_v24, %v1209_v56  ;;  %v1629_v49 = vpack.c.bf16 %v2985_v12, %v2983_v22  ;;  %v1235_v22 = vpop.f32.mrf.mxu1 }
 0x17d   : > { %2998 = vtanh.f32 %v1577_v23  ;;  %v1475_v29 = vpop.f32.mrf.mxu0  ;;  %v2987_v55 = vpop.eup %2986  ;;  %v1244_v2 = vadd.f32 %v2849_v20, %v3627_v40  ;;  %v1236_v12 = vadd.f32 %v1235_v22, %v3631_v42 }
 0x17e   : > { %3000 = vtanh.f32 %v1578_v45  ;;  %v1542_v51 = vadd.f32 %v1475_v29, %v1201_v26  ;;  %2902 = vmatprep.mubr.msk.bf16.mxu1 %vm1680_vm1, %v1629_v49  ;;  %v1583_v3 = vadd.f32 %v3636_v47, %v1544_v5 }
 0x17f   : > { %v2877_v27 = vpop.f32.mrf.mxu0  ;;  %2903 = vmatmul.mubr.msk.bf16.gmra.mxu1 %vm1680_vm1, %v1630_v1 }
 0x180   : > { %v1545_v32 = vadd.f32 %v2877_v27, %v1212_v25  ;;  %v1581_v53 = vadd.f32 %v3636_v47, %v1542_v51  ;;  %3002 = vtanh.f32 %v1583_v3 }
 0x181   : > { %v2989_v8 = vpop.eup %2988  ;;  %v1478_v54 = vpop.f32.mrf.mxu0 }
 0x182   : > { %v2991_v28 = vpop.eup %2990  ;;  %v1584_v11 = vadd.f32 %v3636_v47, %v1545_v32  ;;  %v1543_v16 = vadd.f32 %v1478_v54, %v1204_v15  ;;  %v1632_v35 = vpack.c.bf16 %v2989_v8, %v2987_v55 }
 0x183   : > { %v2993_v6 = vpop.eup %2992  ;;  %v2880_v57 = vpop.f32.mrf.mxu0 }
 0x184   : > { %3004 = vtanh.f32 %v1584_v11  ;;  %v1582_v30 = vadd.f32 %v3636_v47, %v1543_v16  ;;  %v1548_v50 = vadd.f32 %v2880_v57, %v1225_v43  ;;  %v1631_v58 = vpack.c.bf16 %v2993_v6, %v2991_v28  ;;  %v3748_v11 = vld [vmem:[%s4332_s4] ss:$0 sm:$0xff] }
 0x185   : > { %3006 = vtanh.f32 %v1581_v53  ;;  %v1491_v17 = vpop.f32.mrf.mxu0  ;;  %v2995_v33 = vpop.eup %2994 }
 0x186   : > { %3008 = vtanh.f32 %v1582_v30  ;;  %v1546_v31 = vadd.f32 %v1491_v17, %v1217_v14  ;;  %2906 = vmatprep.mubr.msk.bf16.mxu1 %vm1680_vm1, %v1631_v58  ;;  %v1587_v4 = vadd.f32 %v3636_v47, %v1548_v50 }
 0x187   : > { %v2881_v38 = vpop.f32.mrf.mxu0  ;;  %2907 = vmatmul.mubr.msk.bf16.gmra.mxu1 %vm1680_vm1, %v1632_v35 }
 0x188   : > { %v1549_v60 = vadd.f32 %v2881_v38, %v1228_v18  ;;  %v1585_v19 = vadd.f32 %v3636_v47, %v1546_v31  ;;  %3010 = vtanh.f32 %v1587_v4 }
 0x189   : > { %v2997_v9 = vpop.eup %2996  ;;  %v1494_v41 = vpop.f32.mrf.mxu0 }
 0x18a   : > { %v2999_v61 = vpop.eup %2998  ;;  %v1588_v21 = vadd.f32 %v3636_v47, %v1549_v60  ;;  %v1547_v48 = vadd.f32 %v1494_v41, %v1220_v59  ;;  %v1634_v44 = vpack.c.bf16 %v2997_v9, %v2995_v33 }
 0x18b   : > { %v3001_v62 = vpop.eup %3000  ;;  %v2884_v10 = vpop.f32.mrf.mxu0 }
 0x18c   : > { %3012 = vtanh.f32 %v1588_v21  ;;  %v1586_v36 = vadd.f32 %v3636_v47, %v1547_v48  ;;  %v1552_v23 = vadd.f32 %v2884_v10, %v1241_v34  ;;  %v1633_v0 = vpack.c.bf16 %v3001_v62, %v2999_v61 }
 0x18d   : > { %3014 = vtanh.f32 %v1585_v19  ;;  %v1507_v56 = vpop.f32.mrf.mxu0  ;;  %v3003_v39 = vpop.eup %3002 }
 0x18e   : > { %3016 = vtanh.f32 %v1586_v36  ;;  %v1550_v37 = vadd.f32 %v1507_v56, %v1233_v63  ;;  %2910 = vmatprep.mubr.msk.bf16.mxu1 %vm1680_vm1, %v1633_v0  ;;  %v1591_v46 = vadd.f32 %v3636_v47, %v1552_v23 }
 0x18f   : > { %v2885_v1 = vpop.f32.mrf.mxu0  ;;  %2911 = vmatmul.mubr.msk.bf16.gmra.mxu1 %vm1680_vm1, %v1634_v44 }
 0x190   : > { %v1553_v26 = vadd.f32 %v2885_v1, %v1244_v2  ;;  %v1589_v45 = vadd.f32 %v3636_v47, %v1550_v37  ;;  %3018 = vtanh.f32 %v1591_v46 }
 0x191   : > { %v3005_v24 = vpop.eup %3004  ;;  %v1510_v5 = vpop.f32.mrf.mxu0 }
 0x192   : > { %v3007_v49 = vpop.eup %3006  ;;  %v1592_v40 = vadd.f32 %v3636_v47, %v1553_v26  ;;  %v1551_v13 = vadd.f32 %v1510_v5, %v1236_v12  ;;  %v1636_v29 = vpack.c.bf16 %v3005_v24, %v3003_v39 }
 0x193   : > { %v3009_v25 = vpop.eup %3008 }
 0x194   : > { %3020 = vtanh.f32 %v1592_v40  ;;  %v1590_v51 = vadd.f32 %v3636_v47, %v1551_v13  ;;  %v1635_v3 = vpack.c.bf16 %v3009_v25, %v3007_v49 }
 0x195   : > { %3022 = vtanh.f32 %v1589_v45  ;;  %v3011_v42 = vpop.eup %3010 }
 0x196   : > { %3024 = vtanh.f32 %v1590_v51  ;;  %2914 = vmatprep.mubr.msk.bf16.mxu1 %vm1680_vm1, %v1635_v3 }
 0x197   : > { %2915 = vmatmul.mubr.msk.bf16.gmra.mxu1 %vm1680_vm1, %v1636_v29 }
 0x199   : > { %v3013_v27 = vpop.eup %3012 }
 0x19a   : > { %v3015_v55 = vpop.eup %3014  ;;  %v1638_v15 = vpack.c.bf16 %v3013_v27, %v3011_v42 }
 0x19b   : > { %v3017_v32 = vpop.eup %3016 }
 0x19c   : > { %v1637_v8 = vpack.c.bf16 %v3017_v32, %v3015_v55 }
 0x19d   : > { %v3019_v52 = vpop.eup %3018 }
 0x19e   : > { %2918 = vmatprep.mubr.msk.bf16.mxu1 %vm1680_vm1, %v1637_v8 }
 0x19f   : > { %2919 = vmatmul.mubr.msk.bf16.gmra.mxu1 %vm1680_vm1, %v1638_v15 }
 0x1a1   : > { %v3021_v53 = vpop.eup %3020 }
 0x1a2   : > { %v3023_v47 = vpop.eup %3022  ;;  %v1640_v54 = vpack.c.bf16 %v3021_v53, %v3019_v52 }
 0x1a3   : > { %v3025_v28 = vpop.eup %3024 }
 0x1a4   : > { %v1639_v43 = vpack.c.bf16 %v3025_v28, %v3023_v47 }
 0x1a6   : > { %2922 = vmatprep.mubr.msk.bf16.mxu1 %vm1680_vm1, %v1639_v43 }
 0x1a7   : > { %2923 = vmatmul.mubr.msk.bf16.gmra.mxu1 %vm1680_vm1, %v1640_v54 }
 0x22f   : > { %v2896_v16 = vpop.f32.mrf.mxu1 }
 0x230   : > { %v3751_v35 = vadd.f32 %v2896_v16, %v3748_v11 }
 0x231   : > { %v1763_v6 = vpop.f32.mrf.mxu1 }
 0x232   : > { %v3754_v14 = vadd.f32 %v3748_v11, %v1763_v6  ;;  %v1896_v57 = vsel %vm816_vm0, %v3751_v35, 0.0  ;;  %v1988_v7 = vmul.f32 %v3751_v35, %v3751_v35 }
 0x233   : > { %1897 = vadd.xlane.f32.xlu1 %v1896_v57  ;;  %v2897_v30 = vpop.f32.mrf.mxu1 }
 0x234   : > { %v3759_v50 = vadd.f32 %v2897_v30, %v3748_v11  ;;  %v1890_v58 = vsel %vm816_vm0, %v3754_v14, 0.0  ;;  %v2024_v33 = vsel %vm816_vm0, %v1988_v7, 0.0  ;;  %v1986_v59 = vmul.f32 %v3754_v14, %v3754_v14 }
 0x235   : > { %v1766_v17 = vpop.f32.mrf.mxu1  ;;  %1891 = vadd.xlane.f32.xlu0 %v1890_v58 }
 0x236   : > { %v3766_v18 = vadd.f32 %v3748_v11, %v1766_v17  ;;  %v1899_v31 = vsel %vm816_vm0, %v3759_v50, 0.0  ;;  %v1989_v4 = vmul.f32 %v3759_v50, %v3759_v50  ;;  %v2018_v41 = vsel %vm816_vm0, %v1986_v59, 0.0 }
 0x237   : > { %1900 = vadd.xlane.f32.xlu1 %v1899_v31  ;;  %v2900_v38 = vpop.f32.mrf.mxu1 }
 0x238   : > { %v2027_v9 = vsel %vm816_vm0, %v1989_v4, 0.0  ;;  %v1987_v20 = vmul.f32 %v3766_v18, %v3766_v18  ;;  %v3784_v48 = vadd.f32 %v2900_v38, %v3748_v11  ;;  %v1893_v44 = vsel %vm816_vm0, %v3766_v18, 0.0 }
 0x239   : > { %v1779_v60 = vpop.f32.mrf.mxu1  ;;  %2025 = vadd.xlane.f32.xlu0 %v2024_v33 }
 0x23a   : > { %v2021_v34 = vsel %vm816_vm0, %v1987_v20, 0.0  ;;  %v3794_v36 = vadd.f32 %v3748_v11, %v1779_v60  ;;  %v1908_v23 = vsel %vm816_vm0, %v3784_v48, 0.0  ;;  %v1992_v37 = vmul.f32 %v3784_v48, %v3784_v48 }
 0x23b   : > { %2028 = vadd.xlane.f32.xlu1 %v2027_v9  ;;  %v2901_v19 = vpop.f32.mrf.mxu1 }
 0x23c   : > { %v3780_v61 = vadd.f32 %v2901_v19, %v3748_v11  ;;  %v1902_v2 = vsel %vm816_vm0, %v3794_v36, 0.0  ;;  %v2036_v12 = vsel %vm816_vm0, %v1992_v37, 0.0  ;;  %v1990_v26 = vmul.f32 %v3794_v36, %v3794_v36 }
 0x23d   : > { %2019 = vadd.xlane.f32.xlu0 %v2018_v41  ;;  %v1782_v21 = vpop.f32.mrf.mxu1 }
 0x23e   : > { %v3789_v62 = vadd.f32 %v3748_v11, %v1782_v21  ;;  %v1911_v63 = vsel %vm816_vm0, %v3780_v61, 0.0  ;;  %v1993_v22 = vmul.f32 %v3780_v61, %v3780_v61  ;;  %v2030_v40 = vsel %vm816_vm0, %v1990_v26, 0.0 }
 0x23f   : > { %2022 = vadd.xlane.f32.xlu1 %v2021_v34  ;;  %v2904_v10 = vpop.f32.mrf.mxu1 }
 0x240   : > { %v1905_v0 = vsel %vm816_vm0, %v3789_v62, 0.0  ;;  %v2039_v46 = vsel %vm816_vm0, %v1993_v22, 0.0  ;;  %v1991_v1 = vmul.f32 %v3789_v62, %v3789_v62  ;;  %v3817_v49 = vadd.f32 %v2904_v10, %v3748_v11 }
 0x241   : > { %1894 = vadd.xlane.f32.xlu0 %v1893_v44  ;;  %v1795_v56 = vpop.f32.mrf.mxu1 }
 0x242   : > { %v2033_v45 = vsel %vm816_vm0, %v1991_v1, 0.0  ;;  %v3826_v51 = vadd.f32 %v3748_v11, %v1795_v56  ;;  %v1920_v3 = vsel %vm816_vm0, %v3817_v49, 0.0  ;;  %v1996_v32 = vmul.f32 %v3817_v49, %v3817_v49 }
 0x243   : > { %1912 = vadd.xlane.f32.xlu1 %v1911_v63  ;;  %v2905_v39 = vpop.f32.mrf.mxu1 }
 0x244   : > { %v3813_v24 = vadd.f32 %v2905_v39, %v3748_v11  ;;  %v1914_v15 = vsel %vm816_vm0, %v3826_v51, 0.0  ;;  %v2048_v47 = vsel %vm816_vm0, %v1996_v32, 0.0  ;;  %v1994_v54 = vmul.f32 %v3826_v51, %v3826_v51 }
 0x245   : > { %1909 = vadd.xlane.f32.xlu0 %v1908_v23  ;;  %v1798_v5 = vpop.f32.mrf.mxu1 }
 0x246   : > { %v3821_v13 = vadd.f32 %v3748_v11, %v1798_v5  ;;  %v1923_v29 = vsel %vm816_vm0, %v3813_v24, 0.0  ;;  %v1997_v27 = vmul.f32 %v3813_v24, %v3813_v24  ;;  %v2042_v57 = vsel %vm816_vm0, %v1994_v54, 0.0 }
 0x247   : > { %1906 = vadd.xlane.f32.xlu1 %v1905_v0  ;;  %v2908_v25 = vpop.f32.mrf.mxu1 }
 0x248   : > { %v1917_v42 = vsel %vm816_vm0, %v3821_v13, 0.0  ;;  %v2051_v8 = vsel %vm816_vm0, %v1997_v27, 0.0  ;;  %v1995_v52 = vmul.f32 %v3821_v13, %v3821_v13  ;;  %v3849_v6 = vadd.f32 %v2908_v25, %v3748_v11 }
 0x249   : > { %1903 = vadd.xlane.f32.xlu0 %v1902_v2  ;;  %v1811_v55 = vpop.f32.mrf.mxu1 }
 0x24a   : > { %v2045_v43 = vsel %vm816_vm0, %v1995_v52, 0.0  ;;  %v3858_v17 = vadd.f32 %v3748_v11, %v1811_v55  ;;  %v1932_v31 = vsel %vm816_vm0, %v3849_v6, 0.0  ;;  %v2000_v60 = vmul.f32 %v3849_v6, %v3849_v6 }
 0x24b   : > { %2040 = vadd.xlane.f32.xlu1 %v2039_v46  ;;  %v2909_v53 = vpop.f32.mrf.mxu1 }
 0x24c   : > { %v3845_v28 = vadd.f32 %v2909_v53, %v3748_v11  ;;  %v1926_v59 = vsel %vm816_vm0, %v3858_v17, 0.0  ;;  %v2060_v41 = vsel %vm816_vm0, %v2000_v60, 0.0  ;;  %v1998_v34 = vmul.f32 %v3858_v17, %v3858_v17 }
 0x24d   : > { %2037 = vadd.xlane.f32.xlu0 %v2036_v12  ;;  %v1814_v16 = vpop.f32.mrf.mxu1 }
 0x24e   : > { %v3853_v30 = vadd.f32 %v3748_v11, %v1814_v16  ;;  %v1935_v58 = vsel %vm816_vm0, %v3845_v28, 0.0  ;;  %v2001_v38 = vmul.f32 %v3845_v28, %v3845_v28  ;;  %v2054_v23 = vsel %vm816_vm0, %v1998_v34, 0.0 }
 0x24f   : > { %2034 = vadd.xlane.f32.xlu1 %v2033_v45  ;;  %v2912_v7 = vpop.f32.mrf.mxu1 }
 0x250   : > { %v1929_v4 = vsel %vm816_vm0, %v3853_v30, 0.0  ;;  %v2063_v9 = vsel %vm816_vm0, %v2001_v38, 0.0  ;;  %v1999_v20 = vmul.f32 %v3853_v30, %v3853_v30  ;;  %v3881_v10 = vadd.f32 %v2912_v7, %v3748_v11 }
 0x251   : > { %2031 = vadd.xlane.f32.xlu0 %v2030_v40  ;;  %v1827_v33 = vpop.f32.mrf.mxu1 }
 0x252   : > { %v2057_v44 = vsel %vm816_vm0, %v1999_v20, 0.0  ;;  %v3890_v2 = vadd.f32 %v3748_v11, %v1827_v33  ;;  %v1944_v37 = vsel %vm816_vm0, %v3881_v10, 0.0  ;;  %v2004_v26 = vmul.f32 %v3881_v10, %v3881_v10 }
 0x253   : > { %1924 = vadd.xlane.f32.xlu1 %v1923_v29  ;;  %v2913_v19 = vpop.f32.mrf.mxu1 }
 0x254   : > { %v3877_v21 = vadd.f32 %v2913_v19, %v3748_v11  ;;  %v1938_v12 = vsel %vm816_vm0, %v3890_v2, 0.0  ;;  %v2072_v29 = vsel %vm816_vm0, %v2004_v26, 0.0  ;;  %v2002_v25 = vmul.f32 %v3890_v2, %v3890_v2 }
 0x255   : > { %1921 = vadd.xlane.f32.xlu0 %v1920_v3  ;;  %v1830_v63 = vpop.f32.mrf.mxu1 }
 0x256   : > { %v3885_v0 = vadd.f32 %v3748_v11, %v1830_v63  ;;  %v1947_v22 = vsel %vm816_vm0, %v3877_v21, 0.0  ;;  %v2005_v1 = vmul.f32 %v3877_v21, %v3877_v21 }
 0x257   : > { %1918 = vadd.xlane.f32.xlu1 %v1917_v42  ;;  %v2916_v56 = vpop.f32.mrf.mxu1 }
 0x258   : > { %v1941_v46 = vsel %vm816_vm0, %v3885_v0, 0.0  ;;  %v2075_v45 = vsel %vm816_vm0, %v2005_v1, 0.0  ;;  %v2003_v5 = vmul.f32 %v3885_v0, %v3885_v0  ;;  %v3913_v55 = vadd.f32 %v2916_v56, %v3748_v11 }
 0x259   : > { %1915 = vadd.xlane.f32.xlu0 %v1914_v15  ;;  %v1843_v39 = vpop.f32.mrf.mxu1  ;;  %v2066_v15 = vsel %vm816_vm0, %v2002_v25, 0.0 }
 0x25a   : > { %v2069_v42 = vsel %vm816_vm0, %v2003_v5, 0.0  ;;  %v3922_v53 = vadd.f32 %v3748_v11, %v1843_v39 }
 0x25b   : > { %2052 = vadd.xlane.f32.xlu1 %v2051_v8  ;;  %v2917_v40 = vpop.f32.mrf.mxu1 }
 0x25c   : > { %v3909_v3 = vadd.f32 %v2917_v40, %v3748_v11  ;;  %v2006_v33 = vmul.f32 %v3922_v53, %v3922_v53 }
 0x25d   : > { %2049 = vadd.xlane.f32.xlu0 %v2048_v47  ;;  %v1846_v27 = vpop.f32.mrf.mxu1  ;;  %v1956_v47 = vsel %vm816_vm0, %v3913_v55, 0.0 }
 0x25e   : > { %v3917_v32 = vadd.f32 %v3748_v11, %v1846_v27  ;;  %v1959_v8 = vsel %vm816_vm0, %v3909_v3, 0.0  ;;  %v2078_v19 = vsel %vm816_vm0, %v2006_v33, 0.0 }
 0x25f   : > { %2046 = vadd.xlane.f32.xlu1 %v2045_v43  ;;  %v2920_v52 = vpop.f32.mrf.mxu1  ;;  %v2009_v43 = vmul.f32 %v3909_v3, %v3909_v3 }
 0x260   : > { %v1953_v54 = vsel %vm816_vm0, %v3917_v32, 0.0  ;;  %v3945_v20 = vadd.f32 %v2920_v52, %v3748_v11 }
 0x261   : > { %2043 = vadd.xlane.f32.xlu0 %v2042_v57  ;;  %v1859_v16 = vpop.f32.mrf.mxu1  ;;  %v1950_v57 = vsel %vm816_vm0, %v3922_v53, 0.0  ;;  %v2087_v7 = vsel %vm816_vm0, %v2009_v43, 0.0 }
 0x262   : > { %v3954_v63 = vadd.f32 %v3748_v11, %v1859_v16  ;;  %v2012_v1 = vmul.f32 %v3945_v20, %v3945_v20 }
 0x263   : > { %1936 = vadd.xlane.f32.xlu1 %v1935_v58  ;;  %v2008_v58 = vmul.f32 %v3913_v55, %v3913_v55 }
 0x264   : > { %v2010_v5 = vmul.f32 %v3954_v63, %v3954_v63 }
 0x265   : > { %1933 = vadd.xlane.f32.xlu0 %v1932_v31  ;;  %v2007_v31 = vmul.f32 %v3917_v32, %v3917_v32  ;;  %v2084_v38 = vsel %vm816_vm0, %v2008_v58, 0.0 }
 0x266   : > { %v2090_v27 = vsel %vm816_vm0, %v2010_v5, 0.0 }
 0x267   : > { %1930 = vadd.xlane.f32.xlu1 %v1929_v4  ;;  %v2921_v4 = vpop.f32.mrf.mxu1  ;;  %v2081_v60 = vsel %vm816_vm0, %v2007_v31, 0.0 }
 0x269   : > { %1927 = vadd.xlane.f32.xlu0 %v1926_v59  ;;  %v3941_v59 = vadd.f32 %v2921_v4, %v3748_v11 }
 0x26b   : > { %2064 = vadd.xlane.f32.xlu1 %v2063_v9  ;;  %v1862_v9 = vpop.f32.mrf.mxu1  ;;  %v1971_v34 = vsel %vm816_vm0, %v3941_v59, 0.0  ;;  %v2013_v56 = vmul.f32 %v3941_v59, %v3941_v59 }
 0x26d   : > { %2061 = vadd.xlane.f32.xlu0 %v2060_v41  ;;  %v3949_v41 = vadd.f32 %v3748_v11, %v1862_v9  ;;  %v2099_v39 = vsel %vm816_vm0, %v2013_v56, 0.0 }
 0x26f   : > { %2058 = vadd.xlane.f32.xlu1 %v2057_v44  ;;  %v2924_v44 = vpop.f32.mrf.mxu1 }
 0x271   : > { %2055 = vadd.xlane.f32.xlu0 %v2054_v23  ;;  %v1968_v23 = vsel %vm816_vm0, %v3945_v20, 0.0 }
 0x273   : > { %1948 = vadd.xlane.f32.xlu1 %v1947_v22  ;;  %v1965_v22 = vsel %vm816_vm0, %v3949_v41, 0.0 }
 0x275   : > { %1945 = vadd.xlane.f32.xlu0 %v1944_v37  ;;  %v1875_v37 = vpop.f32.mrf.mxu1 }
 0x276   : > { %v3986_v52 = vadd.f32 %v3748_v11, %v1875_v37 }
 0x277   : > { %1942 = vadd.xlane.f32.xlu1 %v1941_v46  ;;  %v1962_v46 = vsel %vm816_vm0, %v3954_v63, 0.0  ;;  %v2925_v26 = vpop.f32.mrf.mxu1 }
 0x278   : > { %v3973_v40 = vadd.f32 %v2925_v26, %v3748_v11  ;;  %v1974_v16 = vsel %vm816_vm0, %v3986_v52, 0.0 }
 0x279   : > { %1939 = vadd.xlane.f32.xlu0 %v1938_v12  ;;  %v2011_v12 = vmul.f32 %v3949_v41, %v3949_v41  ;;  %v1878_v25 = vpop.f32.mrf.mxu1 }
 0x27a   : > { %v2017_v58 = vmul.f32 %v3973_v40, %v3973_v40 }
 0x27b   : > { %2076 = vadd.xlane.f32.xlu1 %v2075_v45  ;;  %v2096_v45 = vsel %vm816_vm0, %v2012_v1, 0.0 }
 0x27c   : > { %v2111_v4 = vsel %vm816_vm0, %v2017_v58, 0.0 }
 0x27d   : > { %2073 = vadd.xlane.f32.xlu0 %v2072_v29  ;;  %v2093_v29 = vsel %vm816_vm0, %v2011_v12, 0.0 }
 0x27f   : > { %2070 = vadd.xlane.f32.xlu1 %v2069_v42  ;;  %v3977_v42 = vadd.f32 %v2924_v44, %v3748_v11 }
 0x281   : > { %2067 = vadd.xlane.f32.xlu0 %v2066_v15  ;;  %v3981_v15 = vadd.f32 %v3748_v11, %v1878_v25  ;;  %v2016_v31 = vmul.f32 %v3977_v42, %v3977_v42 }
 0x283   : > { %1960 = vadd.xlane.f32.xlu1 %v1959_v8  ;;  %v1983_v8 = vsel %vm816_vm0, %v3973_v40, 0.0  ;;  %v2015_v43 = vmul.f32 %v3981_v15, %v3981_v15 }
 0x285   : > { %1957 = vadd.xlane.f32.xlu0 %v1956_v47  ;;  %v1980_v47 = vsel %vm816_vm0, %v3977_v42, 0.0  ;;  %v2105_v11 = vsel %vm816_vm0, %v2015_v43, 0.0 }
 0x287   : > { %1954 = vadd.xlane.f32.xlu1 %v1953_v54  ;;  %v1977_v54 = vsel %vm816_vm0, %v3981_v15, 0.0 }
 0x289   : > { %1951 = vadd.xlane.f32.xlu0 %v1950_v57  ;;  %v2014_v57 = vmul.f32 %v3986_v52, %v3986_v52 }
 0x28b   : > { %2088 = vadd.xlane.f32.xlu1 %v2087_v7  ;;  %v2102_v7 = vsel %vm816_vm0, %v2014_v57, 0.0 }
 0x28d   : > { %2085 = vadd.xlane.f32.xlu0 %v2084_v38  ;;  %v2108_v38 = vsel %vm816_vm0, %v2016_v31, 0.0 }
 0x28f   : > { %2082 = vadd.xlane.f32.xlu1 %v2081_v60 }
 0x291   : > { %2079 = vadd.xlane.f32.xlu0 %v2078_v19 }
 0x293   : > { %1972 = vadd.xlane.f32.xlu1 %v1971_v34 }
 0x295   : > { %1969 = vadd.xlane.f32.xlu0 %v1968_v23 }
 0x297   : > { %1966 = vadd.xlane.f32.xlu1 %v1965_v22 }
 0x299   : > { %1963 = vadd.xlane.f32.xlu0 %v1962_v46 }
 0x29b   : > { %2100 = vadd.xlane.f32.xlu1 %v2099_v39 }
 0x29d   : > { %2097 = vadd.xlane.f32.xlu0 %v2096_v45 }
 0x29f   : > { %2094 = vadd.xlane.f32.xlu1 %v2093_v29 }
 0x2a1   : > { %2091 = vadd.xlane.f32.xlu0 %v2090_v27 }
 0x2a3   : > { %1984 = vadd.xlane.f32.xlu1 %v1983_v8 }
 0x2a5   : > { %1981 = vadd.xlane.f32.xlu0 %v1980_v47 }
 0x2a7   : > { %1978 = vadd.xlane.f32.xlu1 %v1977_v54 }
 0x2a9   : > { %1975 = vadd.xlane.f32.xlu0 %v1974_v16 }
 0x2ab   : > { %2106 = vadd.xlane.f32.xlu1 %v2105_v11 }
 0x2ad   : > { %2103 = vadd.xlane.f32.xlu0 %v2102_v7 }
 0x2af   : > { %2112 = vadd.xlane.f32.xlu1 %v2111_v4 }
 0x2b1   : > { %2109 = vadd.xlane.f32.xlu0 %v2108_v38 }
 0x2bc   : > { %v1898_v33 = vpop.xlane.xlu1 %1897 }
 0x2bd   : > { %v2116_v9 = vmul.f32 0.03125, %v1898_v33 }
 0x2be   : > { %v1892_v60 = vpop.xlane.xlu0 %1891 }
 0x2bf   : > { %v2180_v23 = vmul.f32 %v2116_v9, %v2116_v9  ;;  %v4006_v22 = vmul.f32 0.03125, %v1892_v60 }
 0x2c0   : > { %v1901_v19 = vpop.xlane.xlu1 %1900 }
 0x2c1   : > { %v2117_v34 = vmul.f32 0.03125, %v1901_v19  ;;  %v2178_v26 = vmul.f32 %v4006_v22, %v4006_v22 }
 0x2c2   : > { %v2026_v44 = vpop.xlane.xlu0 %2025 }
 0x2c3   : > { %v2148_v56 = vmul.f32 0.03125, %v2026_v44  ;;  %v2181_v46 = vmul.f32 %v2117_v34, %v2117_v34  ;;  %v2244_v44 = vsub.f32 %v3751_v35, %v2116_v9 }
 0x2c4   : > { %v2029_v37 = vpop.xlane.xlu1 %2028 }
 0x2c5   : > { %v2212_v1 = vsub.f32 %v2148_v56, %v2180_v23  ;;  %v2149_v39 = vmul.f32 0.03125, %v2029_v37 }
 0x2c6   : > { %v2020_v12 = vpop.xlane.xlu0 %2019 }
 0x2c7   : > { %v2276_v45 = vadd.f32 1e-05, %v2212_v1  ;;  %v2213_v5 = vsub.f32 %v2149_v39, %v2181_v46  ;;  %v2146_v29 = vmul.f32 0.03125, %v2020_v12  ;;  %v2245_v46 = vsub.f32 %v3759_v50, %v2117_v34  ;;  %v4027_v1 = vld [vmem:[%s4333_s5] ss:$0 sm:$0xff] }
 0x2c8   : > { %v2023_v25 = vpop.xlane.xlu1 %2022  ;;  %v4038_v50 = vld [vmem:[%s4334_s6] ss:$0 sm:$0xff] }
 0x2c9   : > { %3026 = vrsqrt.f32 %v2276_v45  ;;  %v2277_v27 = vadd.f32 1e-05, %v2213_v5  ;;  %v2210_v8 = vsub.f32 %v2146_v29, %v2178_v26  ;;  %v2147_v57 = vmul.f32 0.03125, %v2023_v25 }
 0x2ca   : > { %v1895_v47 = vpop.xlane.xlu0 %1894  ;;  %v2242_v29 = vsub.f32 %v3754_v14, %v4006_v22 }
 0x2cb   : > { %3028 = vrsqrt.f32 %v2277_v27  ;;  %v2274_v54 = vadd.f32 1e-05, %v2210_v8  ;;  %v4010_v43 = vmul.f32 0.03125, %v1895_v47 }
 0x2cc   : > { %v1913_v16 = vpop.xlane.xlu1 %1912 }
 0x2cd   : > { %3030 = vrsqrt.f32 %v2274_v54  ;;  %v2179_v11 = vmul.f32 %v4010_v43, %v4010_v43  ;;  %v4016_v38 = vmul.f32 0.03125, %v1913_v16 }
 0x2ce   : > { %v1910_v58 = vpop.xlane.xlu0 %1909 }
 0x2cf   : > { %v2211_v7 = vsub.f32 %v2147_v57, %v2179_v11  ;;  %v4018_v60 = vmul.f32 0.03125, %v1910_v58  ;;  %v2185_v23 = vmul.f32 %v4016_v38, %v4016_v38 }
 0x2d0   : > { %v1907_v31 = vpop.xlane.xlu1 %1906 }
 0x2d1   : > { %v2275_v4 = vadd.f32 1e-05, %v2211_v7  ;;  %v4029_v39 = vmul.f32 0.03125, %v1907_v31  ;;  %v2184_v35 = vmul.f32 %v4018_v60, %v4018_v60 }
 0x2d2   : > { %v1904_v33 = vpop.xlane.xlu0 %1903 }
 0x2d3   : > { %3032 = vrsqrt.f32 %v2275_v4  ;;  %v4040_v34 = vmul.f32 0.03125, %v1904_v33  ;;  %v2183_v14 = vmul.f32 %v4029_v39, %v4029_v39 }
 0x2d4   : > { %v2041_v19 = vpop.xlane.xlu1 %2040 }
 0x2d5   : > { %v2153_v56 = vmul.f32 0.03125, %v2041_v19  ;;  %v2182_v31 = vmul.f32 %v4040_v34, %v4040_v34 }
 0x2d6   : > { %v3027_v37 = vpop.eup %3026  ;;  %v2038_v12 = vpop.xlane.xlu0 %2037 }
 0x2d7   : > { %v2340_v26 = vmul.f32 %v3027_v37, %v2244_v44  ;;  %v2217_v9 = vsub.f32 %v2153_v56, %v2185_v23  ;;  %v2152_v45 = vmul.f32 0.03125, %v2038_v12 }
 0x2d8   : > { %v3029_v5 = vpop.eup %3028  ;;  %v2035_v25 = vpop.xlane.xlu1 %2034 }
 0x2d9   : > { %v2379_v27 = vmul.f32 %v4027_v1, %v2340_v26  ;;  %v2341_v8 = vmul.f32 %v3029_v5, %v2245_v46  ;;  %v2281_v47 = vadd.f32 1e-05, %v2217_v9  ;;  %v2216_v54 = vsub.f32 %v2152_v45, %v2184_v35 }
 0x2da   : > { %v3031_v16 = vpop.eup %3030  ;;  %v2151_v22 = vmul.f32 0.03125, %v2035_v25  ;;  %v2032_v57 = vpop.xlane.xlu0 %2031  ;;  %v2243_v35 = vsub.f32 %v3766_v18, %v4010_v43 }
 0x2db   : > { %v2418_v11 = vadd.f32 %v4038_v50, %v2379_v27  ;;  %v2380_v58 = vmul.f32 %v4027_v1, %v2341_v8  ;;  %v2338_v7 = vmul.f32 %v3031_v16, %v2242_v29  ;;  %3034 = vrsqrt.f32 %v2281_v47 }
 0x2dc   : > { %v2280_v4 = vadd.f32 1e-05, %v2216_v54  ;;  %v2215_v33 = vsub.f32 %v2151_v22, %v2183_v14  ;;  %v2150_v19 = vmul.f32 0.03125, %v2032_v57  ;;  %v1925_v44 = vpop.xlane.xlu1 %1924  ;;  %v2249_v57 = vsub.f32 %v3780_v61, %v4016_v38 }
 0x2dd   : > { %2450 = vst.msk [vmem:[%s4046_s13 + $0x10] sm:$0xff] %vm816_vm0, %v2418_v11  ;;  %v2419_v23 = vadd.f32 %v4038_v50, %v2380_v58  ;;  %v2377_v56 = vmul.f32 %v4027_v1, %v2338_v7  ;;  %v4065_v25 = vmul.f32 0.03125, %v1925_v44 }
 0x2de   : > { %3036 = vrsqrt.f32 %v2280_v4  ;;  %v2279_v37 = vadd.f32 1e-05, %v2215_v33  ;;  %v2214_v46 = vsub.f32 %v2150_v19, %v2182_v31  ;;  %v1922_v12 = vpop.xlane.xlu0 %1921 }
 0x2df   : > { %2451 = vst.msk [vmem:[%s4046_s13 + $0x18] sm:$0xff] %vm816_vm0, %v2419_v23  ;;  %v2416_v26 = vadd.f32 %v4038_v50, %v2377_v56  ;;  %v4068_v47 = vmul.f32 0.03125, %v1922_v12  ;;  %v2189_v43 = vmul.f32 %v4065_v25, %v4065_v25 }
 0x2e0   : > { %v3033_v9 = vpop.eup %3032  ;;  %3038 = vrsqrt.f32 %v2279_v37  ;;  %v2278_v45 = vadd.f32 1e-05, %v2214_v46  ;;  %v1919_v5 = vpop.xlane.xlu1 %1918  ;;  %v2248_v46 = vsub.f32 %v3784_v48, %v4018_v60 }
 0x2e1   : > { %2448 = vst.msk [vmem:[%s4046_s13] sm:$0xff] %vm816_vm0, %v2416_v26  ;;  %v2339_v29 = vmul.f32 %v3033_v9, %v2243_v35  ;;  %v4070_v54 = vmul.f32 0.03125, %v1919_v5  ;;  %v2188_v11 = vmul.f32 %v4068_v47, %v4068_v47  ;;  %v2247_v9 = vsub.f32 %v3789_v62, %v4029_v39 }
 0x2e2   : > { %3040 = vrsqrt.f32 %v2278_v45  ;;  %v1916_v27 = vpop.xlane.xlu0 %1915 }
 0x2e3   : > { %v2378_v8 = vmul.f32 %v4027_v1, %v2339_v29  ;;  %v2187_v4 = vmul.f32 %v4070_v54, %v4070_v54  ;;  %v4083_v33 = vmul.f32 0.03125, %v1916_v27 }
 0x2e4   : > { %v2053_v16 = vpop.xlane.xlu1 %2052 }
 0x2e5   : > { %v2417_v18 = vadd.f32 %v4038_v50, %v2378_v8  ;;  %v2157_v14 = vmul.f32 0.03125, %v2053_v16  ;;  %v2186_v5 = vmul.f32 %v4083_v33, %v4083_v33  ;;  %v2246_v16 = vsub.f32 %v3794_v36, %v4040_v34 }
 0x2e6   : > { %v2050_v22 = vpop.xlane.xlu0 %2049 }
 0x2e7   : > { %2449 = vst.msk [vmem:[%s4046_s13 + $0x8] sm:$0xff] %vm816_vm0, %v2417_v18  ;;  %v2221_v58 = vsub.f32 %v2157_v14, %v2189_v43  ;;  %v2156_v7 = vmul.f32 0.03125, %v2050_v22 }
 0x2e8   : > { %v3035_v31 = vpop.eup %3034  ;;  %v2047_v19 = vpop.xlane.xlu1 %2046 }
 0x2e9   : > { %v2345_v44 = vmul.f32 %v3035_v31, %v2249_v57  ;;  %v2285_v23 = vadd.f32 1e-05, %v2221_v58  ;;  %v2220_v56 = vsub.f32 %v2156_v7, %v2188_v11  ;;  %v2155_v37 = vmul.f32 0.03125, %v2047_v19 }
 0x2ea   : > { %v2044_v61 = vpop.xlane.xlu0 %2043 }
 0x2eb   : > { %v3037_v38 = vpop.eup %3036  ;;  %v2384_v12 = vmul.f32 %v4027_v1, %v2345_v44  ;;  %3042 = vrsqrt.f32 %v2285_v23  ;;  %v2284_v26 = vadd.f32 1e-05, %v2220_v56  ;;  %v2219_v35 = vsub.f32 %v2155_v37, %v2187_v4 }
 0x2ec   : > { %v2344_v45 = vmul.f32 %v3037_v38, %v2248_v46  ;;  %v2154_v29 = vmul.f32 0.03125, %v2044_v61  ;;  %v1937_v27 = vpop.xlane.xlu1 %1936  ;;  %v2253_v38 = vsub.f32 %v3813_v24, %v4065_v25  ;;  %v2251_v24 = vsub.f32 %v3821_v13, %v4070_v54 }
 0x2ed   : > { %v3039_v8 = vpop.eup %3038  ;;  %v2423_v48 = vadd.f32 %v4038_v50, %v2384_v12  ;;  %3044 = vrsqrt.f32 %v2284_v26  ;;  %v2283_v60 = vadd.f32 1e-05, %v2219_v35  ;;  %v4100_v31 = vmul.f32 0.03125, %v1937_v27 }
 0x2ee   : > { %v2383_v18 = vmul.f32 %v4027_v1, %v2344_v45  ;;  %v2343_v43 = vmul.f32 %v3039_v8, %v2247_v9  ;;  %v2218_v14 = vsub.f32 %v2154_v29, %v2186_v5  ;;  %v1934_v62 = vpop.xlane.xlu0 %1933  ;;  %v2252_v45 = vsub.f32 %v3817_v49, %v4068_v47 }
 0x2ef   : > { %v3041_v39 = vpop.eup %3040  ;;  %2455 = vst.msk [vmem:[%s4046_s13 + $0x38] sm:$0xff] %vm816_vm0, %v2423_v48  ;;  %3046 = vrsqrt.f32 %v2283_v60  ;;  %v4106_v19 = vmul.f32 0.03125, %v1934_v62  ;;  %v2193_v56 = vmul.f32 %v4100_v31, %v4100_v31 }
 0x2f0   : > { %v2422_v22 = vadd.f32 %v4038_v50, %v2383_v18  ;;  %v2382_v57 = vmul.f32 %v4027_v1, %v2343_v43  ;;  %v2342_v11 = vmul.f32 %v3041_v39, %v2246_v16  ;;  %v2282_v58 = vadd.f32 1e-05, %v2218_v14  ;;  %v1931_v7 = vpop.xlane.xlu1 %1930 }
 0x2f1   : > { %v4115_v46 = vmul.f32 0.03125, %v1931_v7  ;;  %v2192_v12 = vmul.f32 %v4106_v19, %v4106_v19 }
 0x2f2   : > { %2454 = vst.msk [vmem:[%s4046_s13 + $0x30] sm:$0xff] %vm816_vm0, %v2422_v22  ;;  %v2421_v36 = vadd.f32 %v4038_v50, %v2382_v57  ;;  %v2381_v34 = vmul.f32 %v4027_v1, %v2342_v11  ;;  %3048 = vrsqrt.f32 %v2282_v58  ;;  %v1928_v4 = vpop.xlane.xlu0 %1927  ;;  %v2250_v58 = vsub.f32 %v3826_v51, %v4083_v33 }
 0x2f3   : > { %v4123_v5 = vmul.f32 0.03125, %v1928_v4  ;;  %v2191_v25 = vmul.f32 %v4115_v46, %v4115_v46 }
 0x2f4   : > { %2453 = vst.msk [vmem:[%s4046_s13 + $0x28] sm:$0xff] %vm816_vm0, %v2421_v36  ;;  %v2420_v44 = vadd.f32 %v4038_v50, %v2381_v34  ;;  %v2065_v23 = vpop.xlane.xlu1 %2064 }
 0x2f5   : > { %v2161_v37 = vmul.f32 0.03125, %v2065_v23  ;;  %v2190_v62 = vmul.f32 %v4123_v5, %v4123_v5 }
 0x2f6   : > { %2452 = vst.msk [vmem:[%s4046_s13 + $0x20] sm:$0xff] %vm816_vm0, %v2420_v44  ;;  %v2062_v61 = vpop.xlane.xlu0 %2061 }
 0x2f7   : > { %v2225_v26 = vsub.f32 %v2161_v37, %v2193_v56  ;;  %v2160_v35 = vmul.f32 0.03125, %v2062_v61 }
 0x2f8   : > { %v3043_v9 = vpop.eup %3042  ;;  %v2059_v29 = vpop.xlane.xlu1 %2058 }
 0x2f9   : > { %v2349_v27 = vmul.f32 %v3043_v9, %v2253_v38  ;;  %v2289_v8 = vadd.f32 1e-05, %v2225_v26  ;;  %v2224_v48 = vsub.f32 %v2160_v35, %v2192_v12  ;;  %v2159_v60 = vmul.f32 0.03125, %v2059_v29 }
 0x2fa   : > { %v3045_v16 = vpop.eup %3044  ;;  %v2056_v18 = vpop.xlane.xlu0 %2055 }
 0x2fb   : > { %v2388_v43 = vmul.f32 %v4027_v1, %v2349_v27  ;;  %v2348_v14 = vmul.f32 %v3045_v16, %v2252_v45  ;;  %3050 = vrsqrt.f32 %v2289_v8  ;;  %v2288_v49 = vadd.f32 1e-05, %v2224_v48 }
 0x2fc   : > { %v3047_v47 = vpop.eup %3046  ;;  %v2223_v39 = vsub.f32 %v2159_v60, %v2191_v25  ;;  %v2158_v22 = vmul.f32 0.03125, %v2056_v18  ;;  %v1949_v57 = vpop.xlane.xlu1 %1948  ;;  %v2257_v48 = vsub.f32 %v3845_v28, %v4100_v31  ;;  %v2256_v18 = vsub.f32 %v3849_v6, %v4106_v19 }
 0x2fd   : > { %v2427_v11 = vadd.f32 %v4038_v50, %v2388_v43  ;;  %v2387_v13 = vmul.f32 %v4027_v1, %v2348_v14  ;;  %v2347_v54 = vmul.f32 %v3047_v47, %v2251_v24  ;;  %3052 = vrsqrt.f32 %v2288_v49 }
 0x2fe   : > { %v2287_v7 = vadd.f32 1e-05, %v2223_v39  ;;  %v2222_v36 = vsub.f32 %v2158_v22, %v2190_v62  ;;  %v1946_v34 = vpop.xlane.xlu0 %1945  ;;  %v4143_v33 = vmul.f32 0.03125, %v1949_v57  ;;  %v2255_v6 = vsub.f32 %v3853_v30, %v4115_v46 }
 0x2ff   : > { %v3049_v4 = vpop.eup %3048  ;;  %2459 = vst.msk [vmem:[%s4046_s13 + $0x58] sm:$0xff] %vm816_vm0, %v2427_v11  ;;  %v2426_v44 = vadd.f32 %v4038_v50, %v2387_v13  ;;  %v2386_v23 = vmul.f32 %v4027_v1, %v2347_v54  ;;  %v4148_v26 = vmul.f32 0.03125, %v1946_v34 }
 0x300   : > { %v2346_v56 = vmul.f32 %v3049_v4, %v2250_v58  ;;  %3054 = vrsqrt.f32 %v2287_v7  ;;  %v2286_v37 = vadd.f32 1e-05, %v2222_v36  ;;  %v1943_v61 = vpop.xlane.xlu1 %1942  ;;  %v2197_v45 = vmul.f32 %v4143_v33, %v4143_v33 }
 0x301   : > { %2458 = vst.msk [vmem:[%s4046_s13 + $0x50] sm:$0xff] %vm816_vm0, %v2426_v44  ;;  %v2425_v51 = vadd.f32 %v4038_v50, %v2386_v23  ;;  %v4155_v27 = vmul.f32 0.03125, %v1943_v61  ;;  %v2196_v60 = vmul.f32 %v4148_v26, %v4148_v26  ;;  %v2254_v44 = vsub.f32 %v3858_v17, %v4123_v5 }
 0x302   : > { %v2385_v38 = vmul.f32 %v4027_v1, %v2346_v56  ;;  %3056 = vrsqrt.f32 %v2286_v37  ;;  %v1940_v12 = vpop.xlane.xlu0 %1939 }
 0x303   : > { %2457 = vst.msk [vmem:[%s4046_s13 + $0x48] sm:$0xff] %vm816_vm0, %v2425_v51  ;;  %v4163_v43 = vmul.f32 0.03125, %v1940_v12  ;;  %v2195_v28 = vmul.f32 %v4155_v27, %v4155_v27 }
 0x304   : > { %v2424_v35 = vadd.f32 %v4038_v50, %v2385_v38  ;;  %v2077_v9 = vpop.xlane.xlu1 %2076 }
 0x305   : > { %v2165_v29 = vmul.f32 0.03125, %v2077_v9  ;;  %v2194_v19 = vmul.f32 %v4163_v43, %v4163_v43 }
 0x306   : > { %2456 = vst.msk [vmem:[%s4046_s13 + $0x40] sm:$0xff] %vm816_vm0, %v2424_v35  ;;  %v2074_v8 = vpop.xlane.xlu0 %2073 }
 0x307   : > { %v2229_v16 = vsub.f32 %v2165_v29, %v2197_v45  ;;  %v2164_v24 = vmul.f32 0.03125, %v2074_v8 }
 0x308   : > { %v3051_v25 = vpop.eup %3050  ;;  %v2071_v14 = vpop.xlane.xlu1 %2070 }
 0x309   : > { %v2353_v49 = vmul.f32 %v3051_v25, %v2257_v48  ;;  %v2293_v47 = vadd.f32 1e-05, %v2229_v16  ;;  %v2228_v62 = vsub.f32 %v2164_v24, %v2196_v60  ;;  %v2163_v39 = vmul.f32 0.03125, %v2071_v14 }
 0x30a   : > { %v3053_v22 = vpop.eup %3052  ;;  %v2068_v31 = vpop.xlane.xlu0 %2067 }
 0x30b   : > { %v2392_v57 = vmul.f32 %v4027_v1, %v2353_v49  ;;  %v2352_v11 = vmul.f32 %v3053_v22, %v2256_v18  ;;  %3058 = vrsqrt.f32 %v2293_v47  ;;  %v2292_v13 = vadd.f32 1e-05, %v2228_v62 }
 0x30c   : > { %v2227_v54 = vsub.f32 %v2163_v39, %v2195_v28  ;;  %v2162_v58 = vmul.f32 0.03125, %v2068_v31  ;;  %v1961_v7 = vpop.xlane.xlu1 %1960  ;;  %v2261_v18 = vsub.f32 %v3877_v21, %v4143_v33  ;;  %v2260_v39 = vsub.f32 %v3881_v10, %v4148_v26 }
 0x30d   : > { %v3055_v36 = vpop.eup %3054  ;;  %v2431_v34 = vadd.f32 %v4038_v50, %v2392_v57  ;;  %v2391_v4 = vmul.f32 %v4027_v1, %v2352_v11  ;;  %3060 = vrsqrt.f32 %v2292_v13  ;;  %v4182_v17 = vmul.f32 0.03125, %v1961_v7 }
 0x30e   : > { %v2351_v23 = vmul.f32 %v3055_v36, %v2255_v6  ;;  %v2291_v56 = vadd.f32 1e-05, %v2227_v54  ;;  %v2226_v37 = vsub.f32 %v2162_v58, %v2194_v19  ;;  %v1958_v30 = vpop.xlane.xlu0 %1957  ;;  %v2259_v10 = vsub.f32 %v3885_v0, %v4155_v27 }
 0x30f   : > { %v3057_v46 = vpop.eup %3056  ;;  %2463 = vst.msk [vmem:[%s4046_s13 + $0x78] sm:$0xff] %vm816_vm0, %v2431_v34  ;;  %v2430_v61 = vadd.f32 %v4038_v50, %v2391_v4  ;;  %v4186_v29 = vmul.f32 0.03125, %v1958_v30  ;;  %v2201_v60 = vmul.f32 %v4182_v17, %v4182_v17 }
 0x310   : > { %v2390_v51 = vmul.f32 %v4027_v1, %v2351_v23  ;;  %v2350_v38 = vmul.f32 %v3057_v46, %v2254_v44  ;;  %3062 = vrsqrt.f32 %v2291_v56  ;;  %v2290_v12 = vadd.f32 1e-05, %v2226_v37  ;;  %v1955_v35 = vpop.xlane.xlu1 %1954 }
 0x311   : > { %2462 = vst.msk [vmem:[%s4046_s13 + $0x70] sm:$0xff] %vm816_vm0, %v2430_v61  ;;  %v4195_v24 = vmul.f32 0.03125, %v1955_v35  ;;  %v2200_v14 = vmul.f32 %v4186_v29, %v4186_v29  ;;  %v2258_v56 = vsub.f32 %v3890_v2, %v4163_v43 }
 0x312   : > { %v2429_v5 = vadd.f32 %v4038_v50, %v2390_v51  ;;  %v2389_v9 = vmul.f32 %v4027_v1, %v2350_v38  ;;  %3064 = vrsqrt.f32 %v2290_v12  ;;  %v1952_v45 = vpop.xlane.xlu0 %1951 }
 0x313   : > { %v4203_v22 = vmul.f32 0.03125, %v1952_v45  ;;  %v2199_v21 = vmul.f32 %v4195_v24, %v4195_v24 }
 0x314   : > { %2461 = vst.msk [vmem:[%s4046_s13 + $0x68] sm:$0xff] %vm816_vm0, %v2429_v5  ;;  %v2428_v8 = vadd.f32 %v4038_v50, %v2389_v9  ;;  %v2089_v48 = vpop.xlane.xlu1 %2088 }
 0x315   : > { %v2169_v16 = vmul.f32 0.03125, %v2089_v48  ;;  %v2198_v26 = vmul.f32 %v4203_v22, %v4203_v22 }
 0x316   : > { %2460 = vst.msk [vmem:[%s4046_s13 + $0x60] sm:$0xff] %vm816_vm0, %v2428_v8  ;;  %v2086_v25 = vpop.xlane.xlu0 %2085 }
 0x317   : > { %v2233_v49 = vsub.f32 %v2169_v16, %v2201_v60  ;;  %v2168_v47 = vmul.f32 0.03125, %v2086_v25 }
 0x318   : > { %v3059_v62 = vpop.eup %3058  ;;  %v2083_v28 = vpop.xlane.xlu1 %2082 }
 0x319   : > { %v2357_v31 = vmul.f32 %v3059_v62, %v2261_v18  ;;  %v2297_v57 = vadd.f32 1e-05, %v2233_v49  ;;  %v2232_v11 = vsub.f32 %v2168_v47, %v2200_v14  ;;  %v2167_v13 = vmul.f32 0.03125, %v2083_v28 }
 0x31a   : > { %v3061_v6 = vpop.eup %3060  ;;  %v2080_v33 = vpop.xlane.xlu0 %2079  ;;  %v2265_v14 = vsub.f32 %v3909_v3, %v4182_v17  ;;  %v2264_v28 = vsub.f32 %v3913_v55, %v4186_v29  ;;  %v2263_v55 = vsub.f32 %v3917_v32, %v4195_v24 }
 0x31b   : > { %v2396_v19 = vmul.f32 %v4027_v1, %v2357_v31  ;;  %v2356_v54 = vmul.f32 %v3061_v6, %v2260_v39  ;;  %3066 = vrsqrt.f32 %v2297_v57  ;;  %v2296_v58 = vadd.f32 1e-05, %v2232_v11 }
 0x31c   : > { %v2231_v7 = vsub.f32 %v2167_v13, %v2199_v21  ;;  %v2166_v36 = vmul.f32 0.03125, %v2080_v33  ;;  %v1973_v34 = vpop.xlane.xlu1 %1972 }
 0x31d   : > { %v3063_v4 = vpop.eup %3062  ;;  %v2435_v44 = vadd.f32 %v4038_v50, %v2396_v19  ;;  %v2395_v23 = vmul.f32 %v4027_v1, %v2356_v54  ;;  %3068 = vrsqrt.f32 %v2296_v58  ;;  %v4222_v2 = vmul.f32 0.03125, %v1973_v34 }
 0x31e   : > { %v2355_v37 = vmul.f32 %v3063_v4, %v2259_v10  ;;  %v2295_v30 = vadd.f32 1e-05, %v2231_v7  ;;  %v2230_v46 = vsub.f32 %v2166_v36, %v2198_v26  ;;  %v1970_v0 = vpop.xlane.xlu0 %1969 }
 0x31f   : > { %v3065_v27 = vpop.eup %3064  ;;  %2467 = vst.msk [vmem:[%s4046_s13 + $0x98] sm:$0xff] %vm816_vm0, %v2435_v44  ;;  %v2434_v61 = vadd.f32 %v4038_v50, %v2395_v23  ;;  %v4226_v45 = vmul.f32 0.03125, %v1970_v0  ;;  %v2205_v60 = vmul.f32 %v4222_v2, %v4222_v2  ;;  %v2262_v44 = vsub.f32 %v3922_v53, %v4203_v22 }
 0x320   : > { %v2394_v51 = vmul.f32 %v4027_v1, %v2355_v37  ;;  %v2354_v38 = vmul.f32 %v3065_v27, %v2258_v56  ;;  %3070 = vrsqrt.f32 %v2295_v30  ;;  %v2294_v12 = vadd.f32 1e-05, %v2230_v46  ;;  %v1967_v35 = vpop.xlane.xlu1 %1966 }
 0x321   : > { %2466 = vst.msk [vmem:[%s4046_s13 + $0x90] sm:$0xff] %vm816_vm0, %v2434_v61  ;;  %v4235_v25 = vmul.f32 0.03125, %v1967_v35  ;;  %v2204_v49 = vmul.f32 %v4226_v45, %v4226_v45 }
 0x322   : > { %v2433_v43 = vadd.f32 %v4038_v50, %v2394_v51  ;;  %v2393_v5 = vmul.f32 %v4027_v1, %v2354_v38  ;;  %3072 = vrsqrt.f32 %v2294_v12  ;;  %v1964_v9 = vpop.xlane.xlu0 %1963 }
 0x323   : > { %v4243_v31 = vmul.f32 0.03125, %v1964_v9  ;;  %v2203_v3 = vmul.f32 %v4235_v25, %v4235_v25 }
 0x324   : > { %2465 = vst.msk [vmem:[%s4046_s13 + $0x88] sm:$0xff] %vm816_vm0, %v2433_v43  ;;  %v2432_v8 = vadd.f32 %v4038_v50, %v2393_v5  ;;  %v2101_v48 = vpop.xlane.xlu1 %2100 }
 0x325   : > { %v2173_v16 = vmul.f32 0.03125, %v2101_v48  ;;  %v2202_v29 = vmul.f32 %v4243_v31, %v4243_v31 }
 0x326   : > { %2464 = vst.msk [vmem:[%s4046_s13 + $0x80] sm:$0xff] %vm816_vm0, %v2432_v8  ;;  %v2098_v18 = vpop.xlane.xlu0 %2097 }
 0x327   : > { %v2237_v47 = vsub.f32 %v2173_v16, %v2205_v60  ;;  %v2172_v62 = vmul.f32 0.03125, %v2098_v18  ;;  %v2269_v60 = vsub.f32 %v3941_v59, %v4222_v2  ;;  %v2267_v2 = vsub.f32 %v3949_v41, %v4235_v25 }
 0x328   : > { %v3067_v39 = vpop.eup %3066  ;;  %v2095_v57 = vpop.xlane.xlu1 %2094 }
 0x329   : > { %v2361_v11 = vmul.f32 %v3067_v39, %v2265_v14  ;;  %v2301_v13 = vadd.f32 1e-05, %v2237_v47  ;;  %v2236_v6 = vsub.f32 %v2172_v62, %v2204_v49  ;;  %v2171_v21 = vmul.f32 0.03125, %v2095_v57 }
 0x32a   : > { %v3069_v33 = vpop.eup %3068  ;;  %v2092_v17 = vpop.xlane.xlu0 %2091  ;;  %v2268_v47 = vsub.f32 %v3945_v20, %v4226_v45 }
 0x32b   : > { %v2400_v19 = vmul.f32 %v4027_v1, %v2361_v11  ;;  %v2360_v54 = vmul.f32 %v3069_v33, %v2264_v28  ;;  %3074 = vrsqrt.f32 %v2301_v13  ;;  %v2300_v58 = vadd.f32 1e-05, %v2236_v6 }
 0x32c   : > { %v2235_v10 = vsub.f32 %v2171_v21, %v2203_v3  ;;  %v2170_v26 = vmul.f32 0.03125, %v2092_v17  ;;  %v1985_v7 = vpop.xlane.xlu1 %1984 }
 0x32d   : > { %v3071_v36 = vpop.eup %3070  ;;  %v2439_v34 = vadd.f32 %v4038_v50, %v2400_v19  ;;  %v2399_v4 = vmul.f32 %v4027_v1, %v2360_v54  ;;  %3076 = vrsqrt.f32 %v2300_v58  ;;  %v2145_v8 = vmul.f32 0.03125, %v1985_v7 }
 0x32e   : > { %v2359_v23 = vmul.f32 %v3071_v36, %v2263_v55  ;;  %v2299_v56 = vadd.f32 1e-05, %v2235_v10  ;;  %v2234_v37 = vsub.f32 %v2170_v26, %v2202_v29  ;;  %v1982_v32 = vpop.xlane.xlu0 %1981  ;;  %v2266_v29 = vsub.f32 %v3954_v63, %v4243_v31 }
 0x32f   : > { %v3073_v24 = vpop.eup %3072  ;;  %2471 = vst.msk [vmem:[%s4046_s13 + $0xb8] sm:$0xff] %vm816_vm0, %v2439_v34  ;;  %v2438_v30 = vadd.f32 %v4038_v50, %v2399_v4  ;;  %v2144_v62 = vmul.f32 0.03125, %v1982_v32  ;;  %v2209_v21 = vmul.f32 %v2145_v8, %v2145_v8 }
 0x330   : > { %v2398_v46 = vmul.f32 %v4027_v1, %v2359_v23  ;;  %v2358_v0 = vmul.f32 %v3073_v24, %v2262_v44  ;;  %3078 = vrsqrt.f32 %v2299_v56  ;;  %v2298_v27 = vadd.f32 1e-05, %v2234_v37  ;;  %v1979_v61 = vpop.xlane.xlu1 %1978 }
 0x331   : > { %2470 = vst.msk [vmem:[%s4046_s13 + $0xb0] sm:$0xff] %vm816_vm0, %v2438_v30  ;;  %v4262_v53 = vmul.f32 0.03125, %v1979_v61  ;;  %v2208_v19 = vmul.f32 %v2144_v62, %v2144_v62 }
 0x332   : > { %v2437_v22 = vadd.f32 %v4038_v50, %v2398_v46  ;;  %v2397_v51 = vmul.f32 %v4027_v1, %v2358_v0  ;;  %3080 = vrsqrt.f32 %v2298_v27  ;;  %v1976_v38 = vpop.xlane.xlu0 %1975  ;;  %v2273_v0 = vsub.f32 %v3973_v40, %v2145_v8 }
 0x333   : > { %v2142_v12 = vmul.f32 0.03125, %v1976_v38  ;;  %v2207_v5 = vmul.f32 %v4262_v53, %v4262_v53  ;;  %v2271_v23 = vsub.f32 %v3981_v15, %v4262_v53  ;;  %v2272_v15 = vsub.f32 %v3977_v42, %v2144_v62 }
 0x334   : > { %2469 = vst.msk [vmem:[%s4046_s13 + $0xa8] sm:$0xff] %vm816_vm0, %v2437_v22  ;;  %v2436_v35 = vadd.f32 %v4038_v50, %v2397_v51  ;;  %v2107_v43 = vpop.xlane.xlu1 %2106 }
 0x335   : > { %v2175_v9 = vmul.f32 0.03125, %v2107_v43  ;;  %v2206_v16 = vmul.f32 %v2142_v12, %v2142_v12  ;;  %v2270_v37 = vsub.f32 %v3986_v52, %v2142_v12 }
 0x336   : > { %2468 = vst.msk [vmem:[%s4046_s13 + $0xa0] sm:$0xff] %vm816_vm0, %v2436_v35  ;;  %v2104_v48 = vpop.xlane.xlu0 %2103 }
 0x337   : > { %v2239_v18 = vsub.f32 %v2175_v9, %v2207_v5  ;;  %v2174_v14 = vmul.f32 0.03125, %v2104_v48 }
 0x338   : > { %v3075_v49 = vpop.eup %3074  ;;  %v2113_v39 = vpop.xlane.xlu1 %2112 }
 0x339   : > { %v2365_v28 = vmul.f32 %v3075_v49, %v2269_v60  ;;  %v2303_v57 = vadd.f32 1e-05, %v2239_v18  ;;  %v2238_v11 = vsub.f32 %v2174_v14, %v2206_v16  ;;  %v2177_v13 = vmul.f32 0.03125, %v2113_v39 }
 0x33a   : > { %v3077_v6 = vpop.eup %3076  ;;  %v2110_v33 = vpop.xlane.xlu0 %2109 }
 0x33b   : > { %v2404_v3 = vmul.f32 %v4027_v1, %v2365_v28  ;;  %v2364_v17 = vmul.f32 %v3077_v6, %v2268_v47  ;;  %3082 = vrsqrt.f32 %v2303_v57  ;;  %v2302_v59 = vadd.f32 1e-05, %v2238_v11 }
 0x33c   : > { %v2241_v20 = vsub.f32 %v2177_v13, %v2209_v21  ;;  %v2176_v45 = vmul.f32 0.03125, %v2110_v33 }
 0x33d   : > { %v3079_v54 = vpop.eup %3078  ;;  %v2443_v58 = vadd.f32 %v4038_v50, %v2404_v3  ;;  %v2403_v55 = vmul.f32 %v4027_v1, %v2364_v17  ;;  %3084 = vrsqrt.f32 %v2302_v59 }
 0x33e   : > { %v2363_v10 = vmul.f32 %v3079_v54, %v2267_v2  ;;  %v2305_v26 = vadd.f32 1e-05, %v2241_v20  ;;  %v2240_v7 = vsub.f32 %v2176_v45, %v2208_v19 }
 0x33f   : > { %v3081_v36 = vpop.eup %3080  ;;  %2475 = vst.msk [vmem:[%s4046_s13 + $0xd8] sm:$0xff] %vm816_vm0, %v2443_v58  ;;  %v2442_v41 = vadd.f32 %v4038_v50, %v2403_v55 }
 0x340   : > { %v2402_v25 = vmul.f32 %v4027_v1, %v2363_v10  ;;  %v2362_v34 = vmul.f32 %v3081_v36, %v2266_v29  ;;  %3086 = vrsqrt.f32 %v2305_v26  ;;  %v2304_v4 = vadd.f32 1e-05, %v2240_v7 }
 0x341   : > { %2474 = vst.msk [vmem:[%s4046_s13 + $0xd0] sm:$0xff] %vm816_vm0, %v2442_v41 }
 0x342   : > { %v2441_v44 = vadd.f32 %v4038_v50, %v2402_v25  ;;  %v2401_v63 = vmul.f32 %v4027_v1, %v2362_v34  ;;  %3088 = vrsqrt.f32 %v2304_v4 }
 0x344   : > { %2473 = vst.msk [vmem:[%s4046_s13 + $0xc8] sm:$0xff] %vm816_vm0, %v2441_v44  ;;  %v2440_v31 = vadd.f32 %v4038_v50, %v2401_v63 }
 0x346   : > { %2472 = vst.msk [vmem:[%s4046_s13 + $0xc0] sm:$0xff] %vm816_vm0, %v2440_v31 }
 0x348   : > { %v3083_v56 = vpop.eup %3082 }
 0x349   : > { %v2367_v32 = vmul.f32 %v3083_v56, %v2271_v23 }
 0x34a   : > { %v3085_v24 = vpop.eup %3084 }
 0x34b   : > { %v2406_v30 = vmul.f32 %v4027_v1, %v2367_v32  ;;  %v2366_v46 = vmul.f32 %v3085_v24, %v2270_v37 }
 0x34d   : > { %v3087_v27 = vpop.eup %3086  ;;  %v2445_v61 = vadd.f32 %v4038_v50, %v2406_v30  ;;  %v2405_v22 = vmul.f32 %v4027_v1, %v2366_v46 }
 0x34e   : > { %v2369_v53 = vmul.f32 %v3087_v27, %v2273_v0 }
 0x34f   : > { %v3089_v51 = vpop.eup %3088  ;;  %2477 = vst.msk [vmem:[%s4046_s13 + $0xe8] sm:$0xff] %vm816_vm0, %v2445_v61  ;;  %v2444_v52 = vadd.f32 %v4038_v50, %v2405_v22 }
 0x350   : > { %v2408_v38 = vmul.f32 %v4027_v1, %v2369_v53  ;;  %v2368_v12 = vmul.f32 %v3089_v51, %v2272_v15 }
 0x351   : > { %2476 = vst.msk [vmem:[%s4046_s13 + $0xe0] sm:$0xff] %vm816_vm0, %v2444_v52 }
 0x352   : > { %v2447_v40 = vadd.f32 %v4038_v50, %v2408_v38  ;;  %v2407_v35 = vmul.f32 %v4027_v1, %v2368_v12 }
 0x354   : > { %2479 = vst.msk [vmem:[%s4046_s13 + $0xf8] sm:$0xff] %vm816_vm0, %v2447_v40  ;;  %v2446_v43 = vadd.f32 %v4038_v50, %v2407_v35 }
 0x356   : > { %2478 = vst.msk [vmem:[%s4046_s13 + $0xf0] sm:$0xff] %vm816_vm0, %v2446_v43 }
 0x357 PF: > { %p14_p9 = scmp.ge.s32.totalorder %s3171_s28, 4   ;;  %s4336_s24 = smov %s3108_s25 }
 0x358   : > { %s4337_s25 = smov %s3180_s8  ;;  %s4338_s26 = smov %s3171_s28 }
 0x359   :  { %16 = sbr.rel (!%p14_p9) target bundleno = 2 (0x2), region = 125 }

</bundles_post_ra>
